<compile_context>
chip_gen: v5e
topology: v5e:2x2
jax: 0.10.0
libtpu: 0.0.40
codegen_flags: <defaults>
</compile_context>

<pallas_src>
import jax
import jax.numpy as jnp
from jax import lax
from jax.experimental import pallas as pl
from jax.experimental.pallas import tpu as pltpu


# ---------------------------------------------------------------------------
# Fused kernel: maxpool(2,2) -> conv3x3+ReLU -> conv3x3+ReLU  (one image)
# ---------------------------------------------------------------------------
def _down_conv_kernel(x_ref, s_ref, w1_ref, b1_ref, w2_ref, b2_ref, m_ref, o_ref):
    # x_ref : (Cin, Ho, 2, W2)  f32   -- H pre-split to (Ho, 2) by a free reshape
    # s_ref : (W2-1, Wo+2)      bf16  -- 0/1: decimate W by 2 + insert L/R pad col
    # w1_ref: (Cout, 9*Cin)     bf16  -- conv1 weights, columns ordered (dh, dw, ci)
    # b1_ref: (Cout, 1)         f32
    # w2_ref: (Cout, 9*Cout)    bf16
    # b2_ref: (Cout, 1)         f32
    # m_ref : (1, M)            f32   -- 1 on valid columns of the flat conv output
    # o_ref : (Cout, Ho, Wo)    f32   -- NCHW block, stored directly
    Cin, Ho, _, W2 = x_ref.shape
    Cout, _, Wo = o_ref.shape
    Wp = Wo + 2                      # padded row width
    M = Ho * Wp - 2                  # flat conv-output length (junk at pad cols)

    # ---- fused 2x2 / stride-2 max pool --------------------------------------
    x = x_ref[...].astype(jnp.bfloat16)                          # (Cin, Ho, 2, W2)
    hmax = jnp.maximum(x[:, :, 0, :], x[:, :, 1, :])             # (Cin, Ho, W2)
    wpair = jnp.maximum(hmax[:, :, : W2 - 1], hmax[:, :, 1:])    # (Cin, Ho, W2-1)
    # decimate along W and insert the per-row zero padding with one exact
    # 0/1 selection matmul (keeps lanes dense, avoids strided lane access).
    prow = jnp.dot(wpair.reshape(Cin * Ho, W2 - 1), s_ref[...],
                   preferred_element_type=jnp.float32)
    prow = prow.astype(jnp.bfloat16).reshape(Cin, Ho, Wp)        # rows = [0, pool_i, 0]

    # ---- flatten padded pooled image row-major onto the lane axis -----------
    zrow = jnp.zeros((Cin, Wp), jnp.bfloat16)
    pp1 = jnp.concatenate([zrow] + [prow[:, i, :] for i in range(Ho)] + [zrow],
                          axis=1)                                # (Cin, (Ho+2)*Wp)

    def conv3x3_relu(pp, w_ref, b_ref):
        # pp: (C, (Ho+2)*Wp) flat padded image.  Every 3x3 tap is a contiguous
        # lane slice of pp, so the whole conv is ONE matmul with K = 9*C.
        taps = jnp.concatenate(
            [pp[:, dh * Wp + dw: dh * Wp + dw + M]
             for dh in range(3) for dw in range(3)], axis=0)     # (9*C, M)
        y = jnp.dot(w_ref[...], taps, preferred_element_type=jnp.float32)
        return jnp.maximum(y + b_ref[...], 0.0)                  # (Cout, M) f32

    y1 = conv3x3_relu(pp1, w1_ref, b1_ref) * m_ref[...]   # zero the intra-row pad cols
    # re-pad the conv1 output in flat space for conv2 (pure concatenation).
    zpad = jnp.zeros((Cout, Wp + 1), jnp.bfloat16)
    pp2 = jnp.concatenate([zpad, y1.astype(jnp.bfloat16), zpad], axis=1)  # (Cout, L)
    y2 = conv3x3_relu(pp2, w2_ref, b2_ref)                        # (Cout, M) f32

    # ---- drop the pad columns and store the NCHW block ----------------------
    o_ref[...] = jnp.concatenate(
        [y2[:, i * Wp: i * Wp + Wo][:, None, :] for i in range(Ho)],
        axis=1).astype(o_ref.dtype)


# ---------------------------------------------------------------------------
# Wrapper (NCHW in -> NCHW out, PyTorch-layout parameters)
# ---------------------------------------------------------------------------
def down_conv_forward(x_nchw, params):
    """downConv.forward.  x: (N, Cin, H, W) f32.
    params: {"w1": (Cout, Cin, 3, 3), "b1": (Cout,),
             "w2": (Cout, Cout, 3, 3), "b2": (Cout,)}  (PyTorch OIHW layout).
    Returns (N, Cout, H//2, W//2) f32."""
    N, Cin, H, W = x_nchw.shape
    w1, b1, w2, b2 = params["w1"], params["b1"], params["w2"], params["b2"]
    Cout = w1.shape[0]
    Ho, Wo = H // 2, W // 2            # MaxPool2d(2,2) floors odd spatial dims
    W2 = 2 * Wo
    Wp = Wo + 2
    M = Ho * Wp - 2

    # free (bitcast) reshape: split H into (Ho, 2) so the pool's H-decimation is a
    # static sublane index in the kernel instead of a strided lane access.
    x = x_nchw[:, :, : 2 * Ho, :W2].reshape(N, Cin, Ho, 2, W2)

    # conv weights: OIHW -> (Cout, 9*Cin), columns ordered (dh, dw, ci); bf16 for MXU.
    w1f = jnp.transpose(w1, (0, 2, 3, 1)).reshape(Cout, 9 * Cin).astype(jnp.bfloat16)
    w2f = jnp.transpose(w2, (0, 2, 3, 1)).reshape(Cout, 9 * Cout).astype(jnp.bfloat16)
    b1c = b1.reshape(Cout, 1).astype(jnp.float32)
    b2c = b2.reshape(Cout, 1).astype(jnp.float32)

    # 0/1 selection: pair-maxed lane w -> padded pooled column k  (w == 2*(k-1))
    sel = (jnp.arange(W2 - 1)[:, None] ==
           2 * (jnp.arange(Wp)[None, :] - 1)).astype(jnp.bfloat16)       # (W2-1, Wp)
    # valid-column mask of the flat conv output (zero at the 2 pad cols per row)
    colm = (jnp.arange(M) % Wp < Wo).astype(jnp.float32)[None, :]        # (1, M)

    # TODO(synk): for large resolutions, add a second "parallel" grid axis that
    # row-tiles H with a 2-row halo so blocks fit v7x's 64 MiB VMEM / v5e's
    # default scoped limit (whole-image blocks are fine at these sizes).
    return pl.pallas_call(
        _down_conv_kernel,
        out_shape=jax.ShapeDtypeStruct((N, Cout, Ho, Wo), x_nchw.dtype),
        grid=(N,),
        in_specs=[
            pl.BlockSpec((None, Cin, Ho, 2, W2), lambda n: (n, 0, 0, 0, 0)),
            pl.BlockSpec((W2 - 1, Wp), lambda n: (0, 0)),
            pl.BlockSpec((Cout, 9 * Cin), lambda n: (0, 0)),
            pl.BlockSpec((Cout, 1), lambda n: (0, 0)),
            pl.BlockSpec((Cout, 9 * Cout), lambda n: (0, 0)),
            pl.BlockSpec((Cout, 1), lambda n: (0, 0)),
            pl.BlockSpec((1, M), lambda n: (0, 0)),
        ],
        out_specs=pl.BlockSpec((None, Cout, Ho, Wo), lambda n: (n, 0, 0, 0)),
        compiler_params=pltpu.CompilerParams(
            dimension_semantics=("parallel",)),
    )(x, sel, w1f, b1c, w2f, b2c, colm)


# ---------------------------------------------------------------------------
# Pure-JAX reference (correctness check only)
# ---------------------------------------------------------------------------
def ref_down_conv(x, w1, b1, w2, b2):
    y = lax.reduce_window(x, -jnp.inf, lax.max,
                          (1, 1, 2, 2), (1, 1, 2, 2), "VALID")

    def conv(z, w, b):
        z = lax.conv_general_dilated(z, w, (1, 1), "SAME",
                                     dimension_numbers=("NCHW", "OIHW", "NCHW"))
        return jnp.maximum(z + b[None, :, None, None], 0.0)

    return conv(conv(y, w1, b1), w2, b2)


# ---------------------------------------------------------------------------
if __name__ == "__main__":
    in_ch, out_ch = 4, 8
    N, H, W = 2, 16, 16

    key = jax.random.PRNGKey(0)
    kx, kw1, kb1, kw2, kb2 = jax.random.split(key, 5)

    x = jax.random.normal(kx, (N, in_ch, H, W), jnp.float32)
    w1 = 0.1 * jax.random.normal(kw1, (out_ch, in_ch, 3, 3), jnp.float32)
    b1 = 0.1 * jax.random.normal(kb1, (out_ch,), jnp.float32)
    w2 = 0.1 * jax.random.normal(kw2, (out_ch, out_ch, 3, 3), jnp.float32)
    b2 = 0.1 * jax.random.normal(kb2, (out_ch,), jnp.float32)
    params = {"w1": w1, "b1": b1, "w2": w2, "b2": b2}

    fwd = jax.jit(down_conv_forward)
    out = jax.block_until_ready(fwd(x, params))
    ref = jax.block_until_ready(ref_down_conv(x, w1, b1, w2, b2))

    assert out.shape == (N, out_ch, H // 2, W // 2), out.shape
    # bf16 MXU operands with f32 accumulation vs. a pure-f32 reference.
    max_err = float(jnp.max(jnp.abs(out - ref)))
    assert jnp.allclose(out, ref, atol=5e-2, rtol=5e-2), max_err

    print("KERNEL_OK")
</pallas_src>

<mosaic_0001>
module attributes {stable_mosaic.version = 11 : i64} {
  func.func @_down_conv_kernel(%arg0: i32, %arg1: memref<1x4x8x2x16xf32, #tpu.memory_space<vmem>>, %arg2: memref<15x10xbf16, #tpu.memory_space<vmem>>, %arg3: memref<8x36xbf16, #tpu.memory_space<vmem>>, %arg4: memref<8x1xf32, #tpu.memory_space<vmem>>, %arg5: memref<8x72xbf16, #tpu.memory_space<vmem>>, %arg6: memref<8x1xf32, #tpu.memory_space<vmem>>, %arg7: memref<1x78xf32, #tpu.memory_space<vmem>>, %arg8: memref<1x8x8x8xf32, #tpu.memory_space<vmem>>) attributes {dimension_semantics = [#tpu.dimension_semantics<parallel>], iteration_bounds = array<i64: 2>, scalar_prefetch = 0 : i64, scratch_operands = 0 : i64, tpu.core_type = #tpu.core_type<tc>, window_params = [{transform_indices = @transform_0, window_bounds = array<i64: 1, 4, 8, 2, 16>}, {pipeline_mode = #tpu.pipeline_mode<synchronous>, transform_indices = @transform_1, window_bounds = array<i64: 15, 10>}, {pipeline_mode = #tpu.pipeline_mode<synchronous>, transform_indices = @transform_2, window_bounds = array<i64: 8, 36>}, {pipeline_mode = #tpu.pipeline_mode<synchronous>, transform_indices = @transform_3, window_bounds = array<i64: 8, 1>}, {pipeline_mode = #tpu.pipeline_mode<synchronous>, transform_indices = @transform_4, window_bounds = array<i64: 8, 72>}, {pipeline_mode = #tpu.pipeline_mode<synchronous>, transform_indices = @transform_5, window_bounds = array<i64: 8, 1>}, {pipeline_mode = #tpu.pipeline_mode<synchronous>, transform_indices = @transform_6, window_bounds = array<i64: 1, 78>}, {transform_indices = @transform_7, window_bounds = array<i64: 1, 8, 8, 8>}]} {
    %c0 = arith.constant 0 : index
    %c0_0 = arith.constant 0 : index
    %c0_1 = arith.constant 0 : index
    %c0_2 = arith.constant 0 : index
    %c0_3 = arith.constant 0 : index
    %0 = vector.load %arg1[%c0, %c0_0, %c0_1, %c0_2, %c0_3] : memref<1x4x8x2x16xf32, #tpu.memory_space<vmem>>, vector<1x4x8x2x16xf32>
    %1 = vector.shape_cast %0 : vector<1x4x8x2x16xf32> to vector<4x8x2x16xf32>
    %2 = arith.truncf %1 : vector<4x8x2x16xf32> to vector<4x8x2x16xbf16>
    %3 = vector.extract_strided_slice %2 {offsets = [0, 0, 0, 0], sizes = [4, 8, 1, 16], strides = [1, 1, 1, 1]} : vector<4x8x2x16xbf16> to vector<4x8x1x16xbf16>
    %4 = vector.shape_cast %3 : vector<4x8x1x16xbf16> to vector<4x8x16xbf16>
    %5 = vector.extract_strided_slice %2 {offsets = [0, 0, 1, 0], sizes = [4, 8, 1, 16], strides = [1, 1, 1, 1]} : vector<4x8x2x16xbf16> to vector<4x8x1x16xbf16>
    %6 = vector.shape_cast %5 : vector<4x8x1x16xbf16> to vector<4x8x16xbf16>
    %7 = arith.maximumf %4, %6 : vector<4x8x16xbf16>
    %8 = vector.extract_strided_slice %7 {offsets = [0, 0, 0], sizes = [4, 8, 15], strides = [1, 1, 1]} : vector<4x8x16xbf16> to vector<4x8x15xbf16>
    %9 = vector.extract_strided_slice %7 {offsets = [0, 0, 1], sizes = [4, 8, 15], strides = [1, 1, 1]} : vector<4x8x16xbf16> to vector<4x8x15xbf16>
    %10 = arith.maximumf %8, %9 : vector<4x8x15xbf16>
    %11 = vector.shape_cast %10 : vector<4x8x15xbf16> to vector<32x15xbf16>
    %c0_4 = arith.constant 0 : index
    %c0_5 = arith.constant 0 : index
    %12 = vector.load %arg2[%c0_4, %c0_5] : memref<15x10xbf16, #tpu.memory_space<vmem>>, vector<15x10xbf16>
    %cst = arith.constant dense<0.000000e+00> : vector<32x10xf32>
    %13 = tpu.matmul %11, %12, %cst {dimension_numbers = #tpu.dot_dimension_numbers<[1], [0], [0], [1], [0, 0, 1, 1], [], []>} : vector<32x15xbf16>, vector<15x10xbf16>, vector<32x10xf32> -> vector<32x10xf32>
    %14 = arith.truncf %13 : vector<32x10xf32> to vector<32x10xbf16>
    %15 = vector.shape_cast %14 : vector<32x10xbf16> to vector<4x8x10xbf16>
    %cst_6 = arith.constant 0.000000e+00 : bf16
    %16 = vector.broadcast %cst_6 : bf16 to vector<4x10xbf16>
    %17 = vector.extract_strided_slice %15 {offsets = [0, 0, 0], sizes = [4, 1, 10], strides = [1, 1, 1]} : vector<4x8x10xbf16> to vector<4x1x10xbf16>
    %18 = vector.shape_cast %17 : vector<4x1x10xbf16> to vector<4x10xbf16>
    %19 = vector.extract_strided_slice %15 {offsets = [0, 1, 0], sizes = [4, 1, 10], strides = [1, 1, 1]} : vector<4x8x10xbf16> to vector<4x1x10xbf16>
    %20 = vector.shape_cast %19 : vector<4x1x10xbf16> to vector<4x10xbf16>
    %21 = vector.extract_strided_slice %15 {offsets = [0, 2, 0], sizes = [4, 1, 10], strides = [1, 1, 1]} : vector<4x8x10xbf16> to vector<4x1x10xbf16>
    %22 = vector.shape_cast %21 : vector<4x1x10xbf16> to vector<4x10xbf16>
    %23 = vector.extract_strided_slice %15 {offsets = [0, 3, 0], sizes = [4, 1, 10], strides = [1, 1, 1]} : vector<4x8x10xbf16> to vector<4x1x10xbf16>
    %24 = vector.shape_cast %23 : vector<4x1x10xbf16> to vector<4x10xbf16>
    %25 = vector.extract_strided_slice %15 {offsets = [0, 4, 0], sizes = [4, 1, 10], strides = [1, 1, 1]} : vector<4x8x10xbf16> to vector<4x1x10xbf16>
    %26 = vector.shape_cast %25 : vector<4x1x10xbf16> to vector<4x10xbf16>
    %27 = vector.extract_strided_slice %15 {offsets = [0, 5, 0], sizes = [4, 1, 10], strides = [1, 1, 1]} : vector<4x8x10xbf16> to vector<4x1x10xbf16>
    %28 = vector.shape_cast %27 : vector<4x1x10xbf16> to vector<4x10xbf16>
    %29 = vector.extract_strided_slice %15 {offsets = [0, 6, 0], sizes = [4, 1, 10], strides = [1, 1, 1]} : vector<4x8x10xbf16> to vector<4x1x10xbf16>
    %30 = vector.shape_cast %29 : vector<4x1x10xbf16> to vector<4x10xbf16>
    %31 = vector.extract_strided_slice %15 {offsets = [0, 7, 0], sizes = [4, 1, 10], strides = [1, 1, 1]} : vector<4x8x10xbf16> to vector<4x1x10xbf16>
    %32 = vector.shape_cast %31 : vector<4x1x10xbf16> to vector<4x10xbf16>
    %33 = tpu.concatenate %16, %18, %20, %22, %24, %26, %28, %30, %32, %16 in 1 : vector<4x10xbf16>, vector<4x10xbf16>, vector<4x10xbf16>, vector<4x10xbf16>, vector<4x10xbf16>, vector<4x10xbf16>, vector<4x10xbf16>, vector<4x10xbf16>, vector<4x10xbf16>, vector<4x10xbf16> -> vector<4x100xbf16>
    %34 = vector.extract_strided_slice %33 {offsets = [0, 0], sizes = [4, 78], strides = [1, 1]} : vector<4x100xbf16> to vector<4x78xbf16>
    %35 = vector.extract_strided_slice %33 {offsets = [0, 1], sizes = [4, 78], strides = [1, 1]} : vector<4x100xbf16> to vector<4x78xbf16>
    %36 = vector.extract_strided_slice %33 {offsets = [0, 2], sizes = [4, 78], strides = [1, 1]} : vector<4x100xbf16> to vector<4x78xbf16>
    %37 = vector.extract_strided_slice %33 {offsets = [0, 10], sizes = [4, 78], strides = [1, 1]} : vector<4x100xbf16> to vector<4x78xbf16>
    %38 = vector.extract_strided_slice %33 {offsets = [0, 11], sizes = [4, 78], strides = [1, 1]} : vector<4x100xbf16> to vector<4x78xbf16>
    %39 = vector.extract_strided_slice %33 {offsets = [0, 12], sizes = [4, 78], strides = [1, 1]} : vector<4x100xbf16> to vector<4x78xbf16>
    %40 = vector.extract_strided_slice %33 {offsets = [0, 20], sizes = [4, 78], strides = [1, 1]} : vector<4x100xbf16> to vector<4x78xbf16>
    %41 = vector.extract_strided_slice %33 {offsets = [0, 21], sizes = [4, 78], strides = [1, 1]} : vector<4x100xbf16> to vector<4x78xbf16>
    %42 = vector.extract_strided_slice %33 {offsets = [0, 22], sizes = [4, 78], strides = [1, 1]} : vector<4x100xbf16> to vector<4x78xbf16>
    %43 = tpu.concatenate %34, %35, %36, %37, %38, %39, %40, %41, %42 in 0 : vector<4x78xbf16>, vector<4x78xbf16>, vector<4x78xbf16>, vector<4x78xbf16>, vector<4x78xbf16>, vector<4x78xbf16>, vector<4x78xbf16>, vector<4x78xbf16>, vector<4x78xbf16> -> vector<36x78xbf16>
    %c0_7 = arith.constant 0 : index
    %c0_8 = arith.constant 0 : index
    %44 = vector.load %arg3[%c0_7, %c0_8] : memref<8x36xbf16, #tpu.memory_space<vmem>>, vector<8x36xbf16>
    %cst_9 = arith.constant dense<0.000000e+00> : vector<8x78xf32>
    %45 = tpu.matmul %44, %43, %cst_9 {dimension_numbers = #tpu.dot_dimension_numbers<[1], [0], [0], [1], [0, 0, 1, 1], [], []>} : vector<8x36xbf16>, vector<36x78xbf16>, vector<8x78xf32> -> vector<8x78xf32>
    %c0_10 = arith.constant 0 : index
    %c0_11 = arith.constant 0 : index
    %46 = vector.load %arg4[%c0_10, %c0_11] : memref<8x1xf32, #tpu.memory_space<vmem>>, vector<8x1xf32>
    %47 = vector.broadcast %46 : vector<8x1xf32> to vector<8x78xf32>
    %48 = arith.addf %45, %47 : vector<8x78xf32>
    %cst_12 = arith.constant 0.000000e+00 : f32
    %49 = vector.broadcast %cst_12 : f32 to vector<8x78xf32>
    %50 = arith.maximumf %48, %49 : vector<8x78xf32>
    %c0_13 = arith.constant 0 : index
    %c0_14 = arith.constant 0 : index
    %51 = vector.load %arg7[%c0_13, %c0_14] : memref<1x78xf32, #tpu.memory_space<vmem>>, vector<1x78xf32>
    %52 = vector.broadcast %51 : vector<1x78xf32> to vector<8x78xf32>
    %53 = arith.mulf %50, %52 : vector<8x78xf32>
    %cst_15 = arith.constant 0.000000e+00 : bf16
    %54 = vector.broadcast %cst_15 : bf16 to vector<8x11xbf16>
    %55 = arith.truncf %53 : vector<8x78xf32> to vector<8x78xbf16>
    %56 = tpu.concatenate %54, %55, %54 in 1 : vector<8x11xbf16>, vector<8x78xbf16>, vector<8x11xbf16> -> vector<8x100xbf16>
    %57 = vector.extract_strided_slice %56 {offsets = [0, 0], sizes = [8, 78], strides = [1, 1]} : vector<8x100xbf16> to vector<8x78xbf16>
    %58 = vector.extract_strided_slice %56 {offsets = [0, 1], sizes = [8, 78], strides = [1, 1]} : vector<8x100xbf16> to vector<8x78xbf16>
    %59 = vector.extract_strided_slice %56 {offsets = [0, 2], sizes = [8, 78], strides = [1, 1]} : vector<8x100xbf16> to vector<8x78xbf16>
    %60 = vector.extract_strided_slice %56 {offsets = [0, 10], sizes = [8, 78], strides = [1, 1]} : vector<8x100xbf16> to vector<8x78xbf16>
    %61 = vector.extract_strided_slice %56 {offsets = [0, 11], sizes = [8, 78], strides = [1, 1]} : vector<8x100xbf16> to vector<8x78xbf16>
    %62 = vector.extract_strided_slice %56 {offsets = [0, 12], sizes = [8, 78], strides = [1, 1]} : vector<8x100xbf16> to vector<8x78xbf16>
    %63 = vector.extract_strided_slice %56 {offsets = [0, 20], sizes = [8, 78], strides = [1, 1]} : vector<8x100xbf16> to vector<8x78xbf16>
    %64 = vector.extract_strided_slice %56 {offsets = [0, 21], sizes = [8, 78], strides = [1, 1]} : vector<8x100xbf16> to vector<8x78xbf16>
    %65 = vector.extract_strided_slice %56 {offsets = [0, 22], sizes = [8, 78], strides = [1, 1]} : vector<8x100xbf16> to vector<8x78xbf16>
    %66 = tpu.concatenate %57, %58, %59, %60, %61, %62, %63, %64, %65 in 0 : vector<8x78xbf16>, vector<8x78xbf16>, vector<8x78xbf16>, vector<8x78xbf16>, vector<8x78xbf16>, vector<8x78xbf16>, vector<8x78xbf16>, vector<8x78xbf16>, vector<8x78xbf16> -> vector<72x78xbf16>
    %c0_16 = arith.constant 0 : index
    %c0_17 = arith.constant 0 : index
    %67 = vector.load %arg5[%c0_16, %c0_17] : memref<8x72xbf16, #tpu.memory_space<vmem>>, vector<8x72xbf16>
    %cst_18 = arith.constant dense<0.000000e+00> : vector<8x78xf32>
    %68 = tpu.matmul %67, %66, %cst_18 {dimension_numbers = #tpu.dot_dimension_numbers<[1], [0], [0], [1], [0, 0, 1, 1], [], []>} : vector<8x72xbf16>, vector<72x78xbf16>, vector<8x78xf32> -> vector<8x78xf32>
    %c0_19 = arith.constant 0 : index
    %c0_20 = arith.constant 0 : index
    %69 = vector.load %arg6[%c0_19, %c0_20] : memref<8x1xf32, #tpu.memory_space<vmem>>, vector<8x1xf32>
    %70 = vector.broadcast %69 : vector<8x1xf32> to vector<8x78xf32>
    %71 = arith.addf %68, %70 : vector<8x78xf32>
    %cst_21 = arith.constant 0.000000e+00 : f32
    %72 = vector.broadcast %cst_21 : f32 to vector<8x78xf32>
    %73 = arith.maximumf %71, %72 : vector<8x78xf32>
    %74 = vector.extract_strided_slice %73 {offsets = [0, 0], sizes = [8, 8], strides = [1, 1]} : vector<8x78xf32> to vector<8x8xf32>
    %75 = vector.shape_cast %74 : vector<8x8xf32> to vector<8x1x8xf32>
    %76 = vector.extract_strided_slice %73 {offsets = [0, 10], sizes = [8, 8], strides = [1, 1]} : vector<8x78xf32> to vector<8x8xf32>
    %77 = vector.shape_cast %76 : vector<8x8xf32> to vector<8x1x8xf32>
    %78 = vector.extract_strided_slice %73 {offsets = [0, 20], sizes = [8, 8], strides = [1, 1]} : vector<8x78xf32> to vector<8x8xf32>
    %79 = vector.shape_cast %78 : vector<8x8xf32> to vector<8x1x8xf32>
    %80 = vector.extract_strided_slice %73 {offsets = [0, 30], sizes = [8, 8], strides = [1, 1]} : vector<8x78xf32> to vector<8x8xf32>
    %81 = vector.shape_cast %80 : vector<8x8xf32> to vector<8x1x8xf32>
    %82 = vector.extract_strided_slice %73 {offsets = [0, 40], sizes = [8, 8], strides = [1, 1]} : vector<8x78xf32> to vector<8x8xf32>
    %83 = vector.shape_cast %82 : vector<8x8xf32> to vector<8x1x8xf32>
    %84 = vector.extract_strided_slice %73 {offsets = [0, 50], sizes = [8, 8], strides = [1, 1]} : vector<8x78xf32> to vector<8x8xf32>
    %85 = vector.shape_cast %84 : vector<8x8xf32> to vector<8x1x8xf32>
    %86 = vector.extract_strided_slice %73 {offsets = [0, 60], sizes = [8, 8], strides = [1, 1]} : vector<8x78xf32> to vector<8x8xf32>
    %87 = vector.shape_cast %86 : vector<8x8xf32> to vector<8x1x8xf32>
    %88 = vector.extract_strided_slice %73 {offsets = [0, 70], sizes = [8, 8], strides = [1, 1]} : vector<8x78xf32> to vector<8x8xf32>
    %89 = vector.shape_cast %88 : vector<8x8xf32> to vector<8x1x8xf32>
    %90 = tpu.concatenate %75, %77, %79, %81, %83, %85, %87, %89 in 1 : vector<8x1x8xf32>, vector<8x1x8xf32>, vector<8x1x8xf32>, vector<8x1x8xf32>, vector<8x1x8xf32>, vector<8x1x8xf32>, vector<8x1x8xf32>, vector<8x1x8xf32> -> vector<8x8x8xf32>
    %c0_22 = arith.constant 0 : index
    %c0_23 = arith.constant 0 : index
    %c0_24 = arith.constant 0 : index
    %c0_25 = arith.constant 0 : index
    %91 = vector.load %arg8[%c0_22, %c0_23, %c0_24, %c0_25] : memref<1x8x8x8xf32, #tpu.memory_space<vmem>>, vector<1x8x8x8xf32>
    %92 = vector.shape_cast %91 : vector<1x8x8x8xf32> to vector<8x8x8xf32>
    %93 = vector.shape_cast %90 : vector<8x8x8xf32> to vector<1x8x8x8xf32>
    tpu.vector_store %arg8[%c0_22, %c0_23, %c0_24, %c0_25], %93 {strides = array<i32>} : memref<1x8x8x8xf32, #tpu.memory_space<vmem>>, vector<1x8x8x8xf32>,
    return
  }
  func.func @transform_0(%arg0: i32) -> (i32, i32, i32, i32, i32) {
    %c0_i32 = arith.constant 0 : i32
    %c0_i32_0 = arith.constant 0 : i32
    %c0_i32_1 = arith.constant 0 : i32
    %c0_i32_2 = arith.constant 0 : i32
    %c0_i32_3 = arith.constant 0 : i32
    return %arg0, %c0_i32, %c0_i32_0, %c0_i32_1, %c0_i32_2 : i32, i32, i32, i32, i32
  }
  func.func @transform_1(%arg0: i32) -> (i32, i32) {
    %c0_i32 = arith.constant 0 : i32
    %c0_i32_0 = arith.constant 0 : i32
    %c0_i32_1 = arith.constant 0 : i32
    return %c0_i32, %c0_i32_0 : i32, i32
  }
  func.func @transform_2(%arg0: i32) -> (i32, i32) {
    %c0_i32 = arith.constant 0 : i32
    %c0_i32_0 = arith.constant 0 : i32
    %c0_i32_1 = arith.constant 0 : i32
    return %c0_i32, %c0_i32_0 : i32, i32
  }
  func.func @transform_3(%arg0: i32) -> (i32, i32) {
    %c0_i32 = arith.constant 0 : i32
    %c0_i32_0 = arith.constant 0 : i32
    %c0_i32_1 = arith.constant 0 : i32
    return %c0_i32, %c0_i32_0 : i32, i32
  }
  func.func @transform_4(%arg0: i32) -> (i32, i32) {
    %c0_i32 = arith.constant 0 : i32
    %c0_i32_0 = arith.constant 0 : i32
    %c0_i32_1 = arith.constant 0 : i32
    return %c0_i32, %c0_i32_0 : i32, i32
  }
  func.func @transform_5(%arg0: i32) -> (i32, i32) {
    %c0_i32 = arith.constant 0 : i32
    %c0_i32_0 = arith.constant 0 : i32
    %c0_i32_1 = arith.constant 0 : i32
    return %c0_i32, %c0_i32_0 : i32, i32
  }
  func.func @transform_6(%arg0: i32) -> (i32, i32) {
    %c0_i32 = arith.constant 0 : i32
    %c0_i32_0 = arith.constant 0 : i32
    %c0_i32_1 = arith.constant 0 : i32
    return %c0_i32, %c0_i32_0 : i32, i32
  }
  func.func @transform_7(%arg0: i32) -> (i32, i32, i32, i32) {
    %c0_i32 = arith.constant 0 : i32
    %c0_i32_0 = arith.constant 0 : i32
    %c0_i32_1 = arith.constant 0 : i32
    %c0_i32_2 = arith.constant 0 : i32
    return %arg0, %c0_i32, %c0_i32_0, %c0_i32_1 : i32, i32, i32, i32
  }
}

</mosaic_0001>

<bundles_post_ra>
// kernel: down_conv_forward.1
= control target key start
LH: loop header
LB: loop body
LE: loop exit
PB: predicated region body
PF: predicated region fallthrough
CT: control target
= control target key end

     0   :  { %12 = vsyncpa [#allocation3], 0  ;;  %s2562_s0 = inlined_call_operand.vmem [shape: f32[2,4,8,2,16], index: 0, kind: input, shape index: {}]   ;;  %s2563_s1 = inlined_call_operand.vmem [shape: bf16[15,10], index: 1, kind: input, shape index: {}]   ;;  %s2564_s2 = inlined_call_operand.vmem [shape: bf16[8,36], index: 2, kind: input, shape index: {}]   ;;  %s2565_s3 = inlined_call_operand.vmem [shape: f32[8,1], index: 3, kind: input, shape index: {}]   ;;  %s2566_s4 = inlined_call_operand.vmem [shape: bf16[8,72], index: 4, kind: input, shape index: {}]   ;;  %s2567_s5 = inlined_call_operand.vmem [shape: f32[8,1], index: 5, kind: input, shape index: {}]   ;;  %s2568_s6 = inlined_call_operand.vmem [shape: f32[1,78], index: 6, kind: input, shape index: {}]   ;;  %s2569_s7 = inlined_call_operand.hbm [shape: f32[2,8,8,8], index: 7, kind: output, shape index: {}]  }
   0x1   :  { %14 = vsyncpa [#allocation3 + $0x1], 0  ;;  %s1932_s24 = smov 0   ;;  %s1934_s25 = smov 0  }
   0x2   :  { %s1936_s26 = smov 0   ;;  %s1938_s27 = smov 0  }
   0x3 LB: > { %s1953_s28 = sadd.s32 4294967295, %s1864_s27   ;;  %s1594_s29 = sadd.s32 4294967294, %s1864_s27   ;;  %s1864_s27 = sphi %s1938_s27, %s2575_s27   ;;  %s1860_s26 = sphi %s1936_s26, %s2574_s26   ;;  %s1856_s25 = sphi %s1934_s25, %s2573_s25   ;;  %s1852_s24 = sphi %s1932_s24, %s2572_s24  }
   0x4   : > { %s1957_s30 = sadd.s32 1, %s1864_s27   ;;  %s179_s8 = sadd.s32 1, %s1860_s26 }
   0x5   : > { %s176_s9 = ssub.s32 %s1864_s27, %s1957_s30  ;;  %p189_p0 = scmp.ne.s32.totalorder %s1860_s26, %s1856_s25 }
   0x6   : > { %p177_p1 = scmp.eq.s32.totalorder %s176_s9, 0  ;;  %p190_p2 = scmp.eq.s32.totalorder %s1953_s28, 1 }
   0x7   : > { %p195_p3 = scmp.ne.s32.totalorder %s1856_s25, %s1852_s24  ;;  %p196_p4 = scmp.eq.s32.totalorder %s1594_s29, 1 }
   0x8   : > { %s1968_s10 = scalar_select %p177_p1, %s1860_s26, %s179_s8  }
   0x9   : > { %p1970_p5 = por %p190_p2, %p189_p0  ;;  %p1974_p6 = por %p196_p4, %p195_p3 }
   0xa   : > { %p1597_p7 = scmp.ge.s32.totalorder %s1864_s27, 1  ;;  %p240_p8 = scmp.lt.s32.totalorder %s1864_s27, 3 }
   0xc   : > { %p241_p9 = pnand %p1597_p7, %p240_p8 }
   0xd   : > { %p272_p10 = scmp.lt.s32.totalorder (!%p241_p9), %s1953_s28, 1  ;;  %s1866_s18 = smov (!%p241_p9), 127  }
   0xe   : > { %244 = sbr.rel (%p241_p9) target bundleno = 1417 (0x589), region = 48  ;;  %s1868_s21 = smov (!%p241_p9), 20  }
   0xf   : > { %s1869_s22 = smov (!%p241_p9), 40   ;;  %s1870_s23 = smov (!%p241_p9), 30  }
  0x10   : > { %s1871_s29 = smov (!%p241_p9), 50   ;;  %s1872_s8 = smov (!%p241_p9), 60  }
  0x11   : > { %s1873_s9 = smov (!%p241_p9), 10   ;;  %s1876_s15 = smov (!%p241_p9), 117  }
  0x12   : > { %s1877_s16 = smov (!%p241_p9), 106   ;;  %s1879_s19 = smov (!%p241_p9), 107  }
  0x13   : > { %s273_s13 = scalar_select %p272_p10, %s1953_s28, 1  ;;  %vm965_vm0 = vcmask 1046528   ;;  %vm966_vm1 = vcmask 1047552   ;;  %vm889_vm2 = vcmask 1041409   ;;  %vm892_vm3 = vcmask 1042434  }
  0x14   : > { %vm895_vm4 = vcmask 1043459   ;;  %vm898_vm5 = vcmask 1044484   ;;  %vm901_vm6 = vcmask 1045509   ;;  %vm904_vm7 = vcmask 1046534   ;;  %s1880_s20 = smov 108  }
  0x15   : > { %s1650_s14 = sshll.u32 %s273_s13, 6  ;;  %vm907_vm8 = vcmask 1047559   ;;  %vm958_vm9 = vcmask 121856   ;;  %s1874_s13 = smov 80   ;;  %vm1087_vm10 = vcmask 80896   ;;  %vm1091_vm11 = vcmask 162816  }
  0x16   : > { %s1985_s17 = scalar_lea.vmem %s2562_s0, %s1650_s14  ;;  %s1875_s14 = smov 70   ;;  %vm1094_vm12 = vcmask 244736   ;;  %vm1097_vm13 = vcmask 326656   ;;  %vm1100_vm14 = vcmask 408576   ;;  %vm1103_vm15 = vcmask 490496  }
  0x17   : > { %v295_v0 = vld [vmem:[%s1985_s17 + $0x22] sm:$0x3]  ;;  %v303_v1 = vld [vmem:[%s1985_s17 + $0x32] sm:$0x3]  ;;  %v294_v2 = vld [vmem:[%s1985_s17 + $0x20] sm:$0x3] }
  0x18   : > { %v423_v3 = vrot.slane %v295_v0, 1  ;;  %v431_v4 = vrot.slane %v303_v1, 1  ;;  %v297_v5 = vld [vmem:[%s1985_s17 + $0x26] sm:$0x3]  ;;  %v422_v6 = vrot.slane %v294_v2, 1 }
  0x19   : > { %v425_v7 = vrot.slane %v297_v5, 1  ;;  %v296_v8 = vld [vmem:[%s1985_s17 + $0x24] sm:$0x3]  ;;  %v304_v9 = vld [vmem:[%s1985_s17 + $0x34] sm:$0x3] }
  0x1a   : > { %v1993_v10 = vmax.f32 %v295_v0, %v423_v3  ;;  %v1995_v11 = vmax.f32 %v303_v1, %v431_v4  ;;  %v1997_v12 = vmax.f32 %v294_v2, %v422_v6  ;;  %v424_v13 = vrot.slane %v296_v8, 1  ;;  %v302_v14 = vld [vmem:[%s1985_s17 + $0x30] sm:$0x3]  ;;  %v305_v15 = vld [vmem:[%s1985_s17 + $0x36] sm:$0x3] }
  0x1b   : > { %v2001_v16 = vmax.f32 %v297_v5, %v425_v7  ;;  %v432_v17 = vrot.slane %v304_v9, 1  ;;  %v430_v18 = vrot.slane %v302_v14, 1  ;;  %v433_v19 = vrot.slane %v305_v15, 1  ;;  %v299_v24 = vld [vmem:[%s1985_s17 + $0x2a] sm:$0x3] }
  0x1c   : > { %v2003_v20 = vmax.f32 %v296_v8, %v424_v13  ;;  %v307_v25 = vld [vmem:[%s1985_s17 + $0x3a] sm:$0x3]  ;;  %v280_v26 = vld [vmem:[%s1985_s17 + $0x4] sm:$0x3]  ;;  %v288_v27 = vld [vmem:[%s1985_s17 + $0x14] sm:$0x3]  ;;  %v1719_v28 = vpack.i.bf16 %v1995_v11, %v1993_v10 }
  0x1d   : > { %v2005_v21 = vmax.f32 %v304_v9, %v432_v17  ;;  %v2007_v22 = vmax.f32 %v302_v14, %v430_v18  ;;  %v2009_v23 = vmax.f32 %v305_v15, %v433_v19  ;;  %v427_v29 = vrot.slane %v299_v24, 1  ;;  %v298_v31 = vld [vmem:[%s1985_s17 + $0x28] sm:$0x3]  ;;  %v306_v32 = vld [vmem:[%s1985_s17 + $0x38] sm:$0x3] }
  0x1e   : > { %v435_v30 = vrot.slane %v307_v25, 1  ;;  %v1729_v33 = vpack.i.bf16 %v2001_v16, %v1997_v12  ;;  %1720 = vrot.lane.b32.xlu0 %v1719_v28, %s1866_s18  ;;  %v408_v36 = vrot.slane %v280_v26, 1  ;;  %v416_v37 = vrot.slane %v288_v27, 1  ;;  %v286_v38 = vld [vmem:[%s1985_s17 + $0x10] sm:$0x3] }
  0x1f   : > { %v2022_v34 = vmax.f32 %v299_v24, %v427_v29  ;;  %v289_v39 = vld [vmem:[%s1985_s17 + $0x16] sm:$0x3]  ;;  %v426_v40 = vrot.slane %v298_v31, 1  ;;  %v434_v41 = vrot.slane %v306_v32, 1  ;;  %v414_v46 = vrot.slane %v286_v38, 1 }
  0x20   : > { %v2024_v35 = vmax.f32 %v307_v25, %v435_v30  ;;  %1730 = vrot.lane.b32.xlu1 %v1729_v33, %s1866_s18  ;;  %v2029_v42 = vmax.f32 %v280_v26, %v408_v36  ;;  %v2031_v43 = vmax.f32 %v288_v27, %v416_v37  ;;  %v417_v47 = vrot.slane %v289_v39, 1  ;;  %v278_v48 = vld [vmem:[%s1985_s17] sm:$0x3]  ;;  %v281_v52 = vld [vmem:[%s1985_s17 + $0x6] sm:$0x3] }
  0x21   : > { %v2033_v44 = vmax.f32 %v298_v31, %v426_v40  ;;  %v2035_v45 = vmax.f32 %v306_v32, %v434_v41  ;;  %v1724_v49 = vpack.i.bf16 %v2005_v21, %v2003_v20  ;;  %v1734_v50 = vpack.i.bf16 %v2009_v23, %v2007_v22  ;;  %v279_v53 = vld [vmem:[%s1985_s17 + $0x2] sm:$0x3]  ;;  %v287_v56 = vld [vmem:[%s1985_s17 + $0x12] sm:$0x3]  ;;  %v282_v57 = vld [vmem:[%s1985_s17 + $0x8] sm:$0x3] }
  0x22   : > { %v2042_v51 = vmax.f32 %v286_v38, %v414_v46  ;;  %v2046_v54 = vmax.f32 %v289_v39, %v417_v47  ;;  %v406_v55 = vrot.slane %v278_v48, 1  ;;  %v409_v58 = vrot.slane %v281_v52, 1  ;;  %v290_v61 = vld [vmem:[%s1985_s17 + $0x18] sm:$0x3]  ;;  %v283_v3 = vld [vmem:[%s1985_s17 + $0xa] sm:$0x3] }
  0x23   : > { %v407_v60 = vrot.slane %v279_v53, 1  ;;  %v1739_v62 = vpack.i.bf16 %v2035_v45, %v2033_v44  ;;  %v415_v63 = vrot.slane %v287_v56, 1  ;;  %v410_v2 = vrot.slane %v282_v57, 1  ;;  %v291_v4 = vld [vmem:[%s1985_s17 + $0x1a] sm:$0x3] }
  0x24   : > { %v2051_v59 = vmax.f32 %v278_v48, %v406_v55  ;;  %v2057_v0 = vmax.f32 %v281_v52, %v409_v58  ;;  %v418_v6 = vrot.slane %v290_v61, 1  ;;  %v300_v7 = vld [vmem:[%s1985_s17 + $0x2c] sm:$0x3]  ;;  %v1749_v8 = vpack.i.bf16 %v2024_v35, %v2022_v34  ;;  %v308_v15 = vld [vmem:[%s1985_s17 + $0x3c] sm:$0x3] }
  0x25   : > { %v2059_v1 = vmax.f32 %v279_v53, %v407_v60  ;;  %1740 = vrot.lane.b32.xlu2 %v1739_v62, %s1866_s18  ;;  %v2064_v5 = vmax.f32 %v287_v56, %v415_v63  ;;  %v1754_v9 = vpack.i.bf16 %v2031_v43, %v2029_v42  ;;  %v411_v13 = vrot.slane %v283_v3, 1  ;;  %v301_v26 = vld [vmem:[%s1985_s17 + $0x2e] sm:$0x3]  ;;  %v309_v27 = vld [vmem:[%s1985_s17 + $0x3e] sm:$0x3] }
  0x26   : > { %1725 = vrot.lane.b32.xlu0 %v1724_v49, %s1866_s18  ;;  %v419_v14 = vrot.slane %v291_v4, 1  ;;  %v2072_v17 = vmax.f32 %v282_v57, %v410_v2  ;;  %v428_v18 = vrot.slane %v300_v7, 1  ;;  %v2074_v19 = vmax.f32 %v290_v61, %v418_v6  ;;  %v285_v31 = vld [vmem:[%s1985_s17 + $0xe] sm:$0x3]  ;;  %v293_v32 = vld [vmem:[%s1985_s17 + $0x1e] sm:$0x3] }
  0x27   : > { %v436_v24 = vrot.slane %v308_v15, 1  ;;  %v1744_v28 = vpack.i.bf16 %v2064_v5, %v2059_v1  ;;  %v2084_v29 = vmax.f32 %v283_v3, %v411_v13  ;;  %v1769_v33 = vpack.i.bf16 %v2046_v54, %v2042_v51  ;;  %v284_v46 = vld [vmem:[%s1985_s17 + $0xc] sm:$0x3]  ;;  %v292_v47 = vld [vmem:[%s1985_s17 + $0x1c] sm:$0x3]  ;;  %s1878_s17 = smov 116  }
  0x28   : > { %1735 = vrot.lane.b32.xlu1 %v1734_v50, %s1866_s18  ;;  %v2077_v25 = vmax.f32 %v300_v7, %v428_v18  ;;  %v2086_v30 = vmax.f32 %v291_v4, %v419_v14  ;;  %v1764_v37 = vpack.i.bf16 %v2057_v0, %v2051_v59  ;;  %v429_v38 = vrot.slane %v301_v26, 1 }
  0x29   : > { %v2092_v36 = vmax.f32 %v308_v15, %v436_v24  ;;  %v437_v39 = vrot.slane %v309_v27, 1  ;;  %v413_v40 = vrot.slane %v285_v31, 1  ;;  %v421_v41 = vrot.slane %v293_v32, 1 }
  0x2a   : > { %v2099_v48 = vmax.f32 %v301_v26, %v429_v38  ;;  %v412_v50 = vrot.slane %v284_v46, 1  ;;  %v420_v52 = vrot.slane %v292_v47, 1  ;;  %v1779_v60 = vpack.i.bf16 %v2074_v19, %v2072_v17 }
  0x2b   : > { %v2101_v49 = vmax.f32 %v309_v27, %v437_v39  ;;  %v1759_v53 = vpack.i.bf16 %v2092_v36, %v2077_v25  ;;  %v2106_v55 = vmax.f32 %v285_v31, %v413_v40  ;;  %v2108_v56 = vmax.f32 %v293_v32, %v421_v41 }
  0x2c   : > { %v2112_v57 = vmax.f32 %v284_v46, %v412_v50  ;;  %v2114_v58 = vmax.f32 %v292_v47, %v420_v52  ;;  %v1784_v61 = vpack.i.bf16 %v2086_v30, %v2084_v29  ;;  %v1867_v31 = vmov 65535  }
  0x2d   : > { %1745 = vrot.lane.b32.xlu2 %v1744_v28, %s1866_s18  ;;  %v1774_v62 = vpack.i.bf16 %v2101_v49, %v2099_v48  ;;  %v1794_v63 = vpack.i.bf16 %v2108_v56, %v2106_v55  ;;  %v1651_v28 = vld [vmem:[%s2563_s1] sm:$0xff]  ;;  %v967_v32 = vsel %vm965_vm0, 4294967295, %v1867_v31 }
  0x2e   : > { %1750 = vrot.lane.b32.xlu0 %v1749_v8, %s1866_s18  ;;  %v1789_v2 = vpack.i.bf16 %v2114_v58, %v2112_v57  ;;  %v968_v38 = vsel %vm966_vm1, %v967_v32, 0  ;;  %vm1106_vm1 = vcmask 572416  }
  0x2f   : > { %v970_v50 = vand.u32 %v1651_v28, %v968_v38 }
  0x30   : > { %1755 = vrot.lane.b32.xlu1 %v1754_v9, %s1866_s18 }
  0x31   : > { %1653 = vmatpush.bf16.msra.mxu3 %v970_v50  ;;  %979 = vmatpush.bf16.msra.mxu0 %v970_v50 }
  0x35   : > { %1760 = vrot.lane.b32.xlu2 %v1759_v53, %s1866_s18 }
  0x36   : > { %1765 = vrot.lane.b32.xlu0 %v1764_v37, %s1866_s18 }
  0x38   : > { %1770 = vrot.lane.b32.xlu1 %v1769_v33, %s1866_s18 }
  0x3d   : > { %1775 = vrot.lane.b32.xlu2 %v1774_v62, %s1866_s18 }
  0x3e   : > { %1780 = vrot.lane.b32.xlu0 %v1779_v60, %s1866_s18 }
  0x40   : > { %1785 = vrot.lane.b32.xlu1 %v1784_v61, %s1866_s18 }
  0x45   : > { %1790 = vrot.lane.b32.xlu2 %v1789_v2, %s1866_s18 }
  0x46   : > { %1795 = vrot.lane.b32.xlu0 %v1794_v63, %s1866_s18 }
  0x7f   : > { %v1741_v3 = vpop.permute.xlu2 %1740 }
  0x80   : > { %v1743_v4 = vunpack.i.h.bf16 %v1741_v3  ;;  %v1742_v6 = vunpack.i.l.bf16 %v1741_v3 }
  0x82   : > { %v722_v7 = vmax.f32 %v2035_v45, %v1743_v4  ;;  %v714_v8 = vmax.f32 %v2033_v44, %v1742_v6 }
  0x84   : > { %v754_v9 = vpack.c.bf16 %v722_v7, %v722_v7  ;;  %v746_v14 = vpack.c.bf16 %v714_v8, %v714_v8 }
  0x86   : > { %v820_v18 = vunpack.c.l.b16 %v754_v9  ;;  %v812_v24 = vunpack.c.l.b16 %v746_v14 }
  0x87   : > { %v1746_v13 = vpop.permute.xlu2 %1745 }
  0x88   : > { %v1748_v15 = vunpack.i.h.bf16 %v1746_v13  ;;  %v1747_v27 = vunpack.i.l.bf16 %v1746_v13  ;;  %v1629_v52 = vunpack.i.l.s16 %v820_v18  ;;  %v1621_v53 = vunpack.i.l.s16 %v812_v24 }
  0x8a   : > { %v703_v37 = vmax.f32 %v2064_v5, %v1748_v15  ;;  %v695_v61 = vmax.f32 %v2059_v1, %v1747_v27 }
  0x8c   : > { %v735_v62 = vpack.c.bf16 %v703_v37, %v703_v37  ;;  %v727_v7 = vpack.c.bf16 %v695_v61, %v695_v61 }
  0x8e   : > { %v801_v9 = vunpack.c.l.b16 %v735_v62 }
  0x8f   : > { %v1761_v47 = vpop.permute.xlu2 %1760 }
  0x90   : > { %v1721_v26 = vpop.permute.xlu0 %1720  ;;  %v1763_v63 = vunpack.i.h.bf16 %v1761_v47  ;;  %v1762_v4 = vunpack.i.l.bf16 %v1761_v47  ;;  %v1610_v37 = vunpack.i.l.s16 %v801_v9 }
  0x91   : > { %v1723_v45 = vunpack.i.h.bf16 %v1721_v26  ;;  %v1722_v33 = vunpack.i.l.bf16 %v1721_v26 }
  0x92   : > { %v1731_v44 = vpop.permute.xlu1 %1730  ;;  %v724_v14 = vmax.f32 %v2092_v36, %v1763_v63  ;;  %v716_v31 = vmax.f32 %v2077_v25, %v1762_v4 }
  0x93   : > { %v1733_v39 = vunpack.i.h.bf16 %v1731_v44  ;;  %v1732_v40 = vunpack.i.l.bf16 %v1731_v44  ;;  %v719_v41 = vmax.f32 %v1995_v11, %v1723_v45  ;;  %v711_v46 = vmax.f32 %v1993_v10, %v1722_v33 }
  0x94   : > { %v2143_v11 = vrot.slane %v1629_v52, 4  ;;  %v2145_v10 = vrot.slane %v1621_v53, 4  ;;  %v793_v45 = vunpack.c.l.b16 %v727_v7  ;;  %v748_v25 = vpack.c.bf16 %v716_v31, %v716_v31 }
  0x95   : > { %v713_v60 = vmax.f32 %v2001_v16, %v1733_v39  ;;  %v743_v5 = vpack.c.bf16 %v711_v46, %v711_v46  ;;  %v710_v2 = vmax.f32 %v1997_v12, %v1732_v40  ;;  %v751_v3 = vpack.c.bf16 %v719_v41, %v719_v41 }
  0x96   : > { %v756_v39 = vpack.c.bf16 %v724_v14, %v724_v14 }
  0x97   : > { %v745_v6 = vpack.c.bf16 %v713_v60, %v713_v60  ;;  %v809_v15 = vunpack.c.l.b16 %v743_v5  ;;  %v742_v18 = vpack.c.bf16 %v710_v2, %v710_v2  ;;  %v817_v12 = vunpack.c.l.b16 %v751_v3  ;;  %v1776_v40 = vpop.permute.xlu2 %1775 }
  0x98   : > { %v1726_v8 = vpop.permute.xlu0 %1725  ;;  %v1602_v60 = vunpack.i.l.s16 %v793_v45  ;;  %v822_v5 = vunpack.c.l.b16 %v756_v39 }
  0x99   : > { %v1728_v16 = vunpack.i.h.bf16 %v1726_v8  ;;  %v1727_v13 = vunpack.i.l.bf16 %v1726_v8  ;;  %v811_v32 = vunpack.c.l.b16 %v745_v6  ;;  %v1618_v41 = vunpack.i.l.s16 %v809_v15 }
  0x9a   : > { %v1736_v1 = vpop.permute.xlu1 %1735  ;;  %v808_v46 = vunpack.c.l.b16 %v742_v18  ;;  %v1626_v50 = vunpack.i.l.s16 %v817_v12  ;;  %v1631_v12 = vunpack.i.l.s16 %v822_v5 }
  0x9b   : > { %v1738_v24 = vunpack.i.h.bf16 %v1736_v1  ;;  %v1737_v26 = vunpack.i.l.bf16 %v1736_v1  ;;  %v720_v27 = vmax.f32 %v2005_v21, %v1728_v16  ;;  %v712_v28 = vmax.f32 %v2003_v20, %v1727_v13 }
  0x9c   : > { %v1620_v53 = vunpack.i.l.s16 %v811_v32  ;;  %v923_v4 = vrot.slane %v1618_v41, 7  ;;  %v1617_v6 = vunpack.i.l.s16 %v808_v46  ;;  %v937_v9 = vrot.slane %v1626_v50, 7 }
  0x9d   : > { %v721_v33 = vmax.f32 %v2009_v23, %v1738_v24  ;;  %v718_v44 = vmax.f32 %v2007_v22, %v1737_v26  ;;  %v752_v36 = vpack.c.bf16 %v720_v27, %v720_v27  ;;  %v744_v38 = vpack.c.bf16 %v712_v28, %v712_v28 }
  0x9e   : > { %v1778_v22 = vunpack.i.h.bf16 %v1776_v40  ;;  %v814_v13 = vunpack.c.l.b16 %v748_v25  ;;  %v1777_v28 = vunpack.i.l.bf16 %v1776_v40  ;;  %v924_v31 = vsel %vm889_vm2, %v923_v4, %v1617_v6 }
  0x9f   : > { %v753_v47 = vpack.c.bf16 %v721_v33, %v721_v33  ;;  %v750_v21 = vpack.c.bf16 %v718_v44, %v718_v44  ;;  %v818_v20 = vunpack.c.l.b16 %v752_v36  ;;  %v810_v52 = vunpack.c.l.b16 %v744_v38 }
  0xa0   : > { %v1751_v61 = vpop.permute.xlu0 %1750  ;;  %v725_v24 = vmax.f32 %v2101_v49, %v1778_v22  ;;  %v2157_v32 = vrot.slane %v1610_v37, 7  ;;  %v927_v46 = vrot.slane %v1620_v53, 5  ;;  %v2165_v37 = vrot.slane %v1631_v12, 2 }
  0xa1   : > { %v816_v23 = vunpack.c.l.b16 %v750_v21  ;;  %v1619_v62 = vunpack.i.l.s16 %v810_v52  ;;  %v819_v63 = vunpack.c.l.b16 %v753_v47  ;;  %v1753_v2 = vunpack.i.h.bf16 %v1751_v61 }
  0xa2   : > { %v1756_v3 = vpop.permute.xlu1 %1755  ;;  %v1627_v7 = vunpack.i.l.s16 %v818_v20  ;;  %v1752_v8 = vunpack.i.l.bf16 %v1751_v61  ;;  %v757_v41 = vpack.c.bf16 %v725_v24, %v725_v24  ;;  %v717_v21 = vmax.f32 %v2099_v48, %v1777_v28 }
  0xa3   : > { %v1625_v16 = vunpack.i.l.s16 %v816_v23  ;;  %v723_v1 = vmax.f32 %v2024_v35, %v1753_v2  ;;  %v925_v14 = vrot.slane %v1619_v62, 6  ;;  %v1758_v18 = vunpack.i.h.bf16 %v1756_v3 }
  0xa4   : > { %v715_v15 = vmax.f32 %v2022_v34, %v1752_v8  ;;  %v1628_v26 = vunpack.i.l.s16 %v819_v63  ;;  %v1757_v27 = vunpack.i.l.bf16 %v1756_v3  ;;  %v939_v45 = vrot.slane %v1627_v7, 6 }
  0xa5   : > { %v704_v33 = vmax.f32 %v2031_v43, %v1758_v18  ;;  %v938_v44 = vsel %vm889_vm2, %v937_v9, %v1625_v16  ;;  %v1623_v35 = vunpack.i.l.s16 %v814_v13  ;;  %v755_v36 = vpack.c.bf16 %v723_v1, %v723_v1 }
  0xa6   : > { %v747_v38 = vpack.c.bf16 %v715_v15, %v715_v15  ;;  %v2161_v34 = vrot.slane %v1602_v60, 7  ;;  %v926_v49 = vsel %vm892_vm3, %v925_v14, %v924_v31  ;;  %v696_v39 = vmax.f32 %v2029_v42, %v1757_v27  ;;  %v1791_v60 = vpop.permute.xlu2 %1790 }
  0xa7   : > { %v941_v47 = vrot.slane %v1628_v26, 5  ;;  %v940_v50 = vsel %vm892_vm3, %v939_v45, %v938_v44  ;;  %v736_v20 = vpack.c.bf16 %v704_v33, %v704_v33  ;;  %v2170_v23 = vsel %vm895_vm4, %v927_v46, %v926_v49 }
  0xa8   : > { %v1766_v40 = vpop.permute.xlu0 %1765  ;;  %v2172_v61 = vrot.slane %v1623_v35, 2  ;;  %v821_v42 = vunpack.c.l.b16 %v755_v36  ;;  %v813_v22 = vunpack.c.l.b16 %v747_v38  ;;  %v728_v53 = vpack.c.bf16 %v696_v39, %v696_v39 }
  0xa9   : > { %v823_v62 = vunpack.c.l.b16 %v757_v41  ;;  %v2177_v5 = vsel %vm895_vm4, %v941_v47, %v940_v50  ;;  %v749_v2 = vpack.c.bf16 %v717_v21, %v717_v21  ;;  %v1768_v3 = vunpack.i.h.bf16 %v1766_v40 }
  0xaa   : > { %v1771_v43 = vpop.permute.xlu1 %1770  ;;  %v1793_v4 = vunpack.i.h.bf16 %v1791_v60  ;;  %v802_v6 = vunpack.c.l.b16 %v736_v20  ;;  %v1767_v9 = vunpack.i.l.bf16 %v1766_v40  ;;  %v1630_v16 = vunpack.i.l.s16 %v821_v42 }
  0xab   : > { %v1773_v52 = vunpack.i.h.bf16 %v1771_v43  ;;  %v1772_v25 = vunpack.i.l.bf16 %v1771_v43  ;;  %v1622_v13 = vunpack.i.l.s16 %v813_v22  ;;  %v697_v1 = vmax.f32 %v2057_v0, %v1768_v3 }
  0xac   : > { %v1792_v14 = vunpack.i.l.bf16 %v1791_v60  ;;  %v794_v15 = vunpack.c.l.b16 %v728_v53  ;;  %v1632_v18 = vunpack.i.l.s16 %v823_v62  ;;  %v815_v26 = vunpack.c.l.b16 %v749_v2 }
  0xad   : > { %v705_v63 = vmax.f32 %v2046_v54, %v1773_v52  ;;  %v702_v48 = vmax.f32 %v2042_v51, %v1772_v25  ;;  %v694_v51 = vmax.f32 %v2051_v59, %v1767_v9  ;;  %v729_v12 = vpack.c.bf16 %v697_v1, %v697_v1 }
  0xae   : > { %v1611_v45 = vunpack.i.l.s16 %v802_v6  ;;  %v1603_v59 = vunpack.i.l.s16 %v794_v15  ;;  %v1624_v46 = vunpack.i.l.s16 %v815_v26  ;;  %v708_v43 = vmax.f32 %v2114_v58, %v1793_v4 }
  0xaf   : > { %v737_v7 = vpack.c.bf16 %v705_v63, %v705_v63  ;;  %v734_v8 = vpack.c.bf16 %v702_v48, %v702_v48  ;;  %v726_v44 = vpack.c.bf16 %v694_v51, %v694_v51  ;;  %v795_v39 = vunpack.c.l.b16 %v729_v12 }
  0xb0   : > { %v1781_v24 = vpop.permute.xlu0 %1780  ;;  %v931_v25 = vrot.slane %v1622_v13, 3  ;;  %v945_v63 = vrot.slane %v1630_v16, 3  ;;  %v891_v48 = vrot.slane %v1603_v59, 6  ;;  %v949_v2 = vrot.slane %v1632_v18, 1 }
  0xb1   : > { %v800_v54 = vunpack.c.l.b16 %v734_v8  ;;  %v1783_v27 = vunpack.i.h.bf16 %v1781_v24  ;;  %v1782_v28 = vunpack.i.l.bf16 %v1781_v24  ;;  %v803_v33 = vunpack.c.l.b16 %v737_v7 }
  0xb2   : > { %v1786_v31 = vpop.permute.xlu1 %1785  ;;  %v792_v41 = vunpack.c.l.b16 %v726_v44  ;;  %v1604_v22 = vunpack.i.l.s16 %v795_v39  ;;  %v740_v58 = vpack.c.bf16 %v708_v43, %v708_v43  ;;  %v935_v3 = vrot.slane %v1624_v46, 1 }
  0xb3   : > { %v1788_v35 = vunpack.i.h.bf16 %v1786_v31  ;;  %v1609_v0 = vunpack.i.l.s16 %v800_v54  ;;  %v706_v36 = vmax.f32 %v2074_v19, %v1783_v27  ;;  %v698_v38 = vmax.f32 %v2072_v17, %v1782_v28 }
  0xb4   : > { %v1787_v49 = vunpack.i.l.bf16 %v1786_v31  ;;  %v1601_v50 = vunpack.i.l.s16 %v792_v41  ;;  %v700_v19 = vmax.f32 %v2112_v57, %v1792_v14  ;;  %v911_v17 = vrot.slane %v1611_v45, 6 }
  0xb5   : > { %v707_v40 = vmax.f32 %v2086_v30, %v1788_v35  ;;  %v738_v47 = vpack.c.bf16 %v706_v36, %v706_v36  ;;  %v730_v21 = vpack.c.bf16 %v698_v38, %v698_v38  ;;  %v1612_v60 = vunpack.i.l.s16 %v803_v33 }
  0xb6   : > { %v699_v52 = vmax.f32 %v2084_v29, %v1787_v49  ;;  %v910_v42 = vsel %vm889_vm2, %v2157_v32, %v1609_v0  ;;  %v890_v29 = vsel %vm889_vm2, %v2161_v34, %v1601_v50  ;;  %v732_v57 = vpack.c.bf16 %v700_v19, %v700_v19 }
  0xb7   : > { %v739_v20 = vpack.c.bf16 %v707_v40, %v707_v40  ;;  %v804_v53 = vunpack.c.l.b16 %v738_v47  ;;  %v796_v30 = vunpack.c.l.b16 %v730_v21  ;;  %v913_v6 = vrot.slane %v1612_v60, 5 }
  0xb8   : > { %v731_v62 = vpack.c.bf16 %v699_v52, %v699_v52  ;;  %v912_v7 = vsel %vm892_vm3, %v911_v17, %v910_v42  ;;  %v930_v32 = vsel %vm898_vm5, %v2145_v10, %v2170_v23  ;;  %v894_v9 = vrot.slane %v1604_v22, 5  ;;  %v1796_v14 = vpop.permute.xlu0 %1795 }
  0xb9   : > { %v805_v4 = vunpack.c.l.b16 %v739_v20  ;;  %v1613_v13 = vunpack.i.l.s16 %v804_v53  ;;  %v1605_v16 = vunpack.i.l.s16 %v796_v30  ;;  %v932_v1 = vsel %vm901_vm6, %v931_v25, %v930_v32 }
  0xba   : > { %v797_v8 = vunpack.c.l.b16 %v731_v62  ;;  %v893_v15 = vsel %vm892_vm3, %v891_v48, %v890_v29  ;;  %v806_v18 = vunpack.c.l.b16 %v740_v58  ;;  %v934_v34 = vsel %vm904_vm7, %v2172_v61, %v932_v1 }
  0xbb   : > { %v944_v54 = vsel %vm898_vm5, %v2143_v11, %v2177_v5  ;;  %v1614_v51 = vunpack.i.l.s16 %v805_v4  ;;  %v798_v24 = vunpack.c.l.b16 %v732_v57  ;;  %v936_v10 = vsel %vm907_vm8, %v935_v3, %v934_v34 }
  0xbc   : > { %v946_v23 = vsel %vm901_vm6, %v945_v63, %v944_v54  ;;  %v1606_v26 = vunpack.i.l.s16 %v797_v8  ;;  %v1798_v27 = vunpack.i.h.bf16 %v1796_v14  ;;  %v1797_v28 = vunpack.i.l.bf16 %v1796_v14 }
  0xbd   : > { %v948_v12 = vsel %vm904_vm7, %v2165_v37, %v946_v23  ;;  %v915_v31 = vrot.slane %v1613_v13, 4  ;;  %v897_v45 = vrot.slane %v1605_v16, 4  ;;  %v914_v44 = vsel %vm895_vm4, %v913_v6, %v912_v7 }
  0xbe   : > { %v950_v61 = vsel %vm907_vm8, %v949_v2, %v948_v12  ;;  %v709_v11 = vmax.f32 %v2108_v56, %v1798_v27  ;;  %v701_v5 = vmax.f32 %v2106_v55, %v1797_v28  ;;  %v896_v35 = vsel %vm895_vm4, %v894_v9, %v893_v15 }
  0xbf   : > { %v952_v33 = vpack.c.b16 %v950_v61, %v936_v10  ;;  %v1615_v0 = vunpack.i.l.s16 %v806_v18  ;;  %v1607_v36 = vunpack.i.l.s16 %v798_v24  ;;  %v917_v38 = vrot.slane %v1614_v51, 3 }
  0xc0   : > { %v900_v37 = vrot.slane %v1606_v26, 3  ;;  %v741_v49 = vpack.c.bf16 %v709_v11, %v709_v11  ;;  %v733_v59 = vpack.c.bf16 %v701_v5, %v701_v5  ;;  %v916_v39 = vsel %vm898_vm5, %v915_v31, %v914_v44 }
  0xc1   : > { %1638 = vmatmul.msk.bf16.vlgmr.msra.gmra.mxu3 %vm958_vm9, %v952_v33  ;;  %v899_v41 = vsel %vm898_vm5, %v897_v45, %v896_v35  ;;  %v919_v46 = vrot.slane %v1615_v0, 2  ;;  %v903_v55 = vrot.slane %v1607_v36, 2  ;;  %v918_v50 = vsel %vm901_vm6, %v917_v38, %v916_v39 }
  0xc2   : > { %v807_v40 = vunpack.c.l.b16 %v741_v49  ;;  %v799_v56 = vunpack.c.l.b16 %v733_v59  ;;  %v902_v43 = vsel %vm901_vm6, %v900_v37, %v899_v41  ;;  %vm1137_vm5 = vcmask 1043456  }
  0xc3   : > { %v905_v19 = vsel %vm904_vm7, %v903_v55, %v902_v43  ;;  %v920_v25 = vsel %vm904_vm7, %v919_v46, %v918_v50  ;;  %vm1140_vm6 = vcmask 1045504   ;;  %vm1159_vm7 = vcmask 293888  }
  0xc4   : > { %v1616_v47 = vunpack.i.l.s16 %v807_v40  ;;  %v1608_v21 = vunpack.i.l.s16 %v799_v56 }
  0xc6   : > { %v921_v20 = vrot.slane %v1616_v47, 1  ;;  %v906_v52 = vrot.slane %v1608_v21, 1 }
  0xc8   : > { %v908_v17 = vsel %vm907_vm8, %v906_v52, %v905_v19  ;;  %v922_v60 = vsel %vm907_vm8, %v921_v20, %v920_v25  ;;  %vm1191_vm8 = vcmask 89088  }
  0xc9   : > { %v951_v42 = vpack.c.b16 %v922_v60, %v908_v17 }
  0xcb   : > { %1637 = vmatmul.msk.bf16.vlgmr.msra.gmra.mxu0 %vm958_vm9, %v951_v42  ;;  %vm1194_vm9 = vcmask 728064  }
 0x144   : > { %v986_v22 = vpop.f32.mrf.mxu3 }
 0x145   : > { %v993_v53 = vpack.c.bf16 %v986_v22, %v986_v22 }
 0x147   : > { %v1001_v48 = vunpack.c.l.b16 %v993_v53 }
 0x148   : > { %v981_v30 = vpop.f32.mrf.mxu0 }
 0x149   : > { %v991_v62 = vpack.c.bf16 %v981_v30, %v981_v30  ;;  %v2221_v29 = vunpack.i.l.s16 %v1001_v48 }
 0x14b   : > { %v999_v58 = vunpack.c.l.b16 %v991_v62  ;;  %v1022_v32 = vrot.slane %v2221_v29, 7  ;;  %v1041_v1 = vrot.slane %v2221_v29, 1  ;;  %v1050_v44 = vrot.slane %v2221_v29, 2 }
 0x14c   : > { %v988_v63 = vpop.f32.mrf.mxu3  ;;  %v1060_v38 = vrot.slane %v2221_v29, 3  ;;  %v1013_v39 = vrot.slane %v2221_v29, 6  ;;  %v1080_v42 = vrot.slane %v2221_v29, 5 }
 0x14d   : > { %v994_v2 = vpack.c.bf16 %v988_v63, %v988_v63  ;;  %v1639_v57 = vunpack.i.l.s16 %v999_v58  ;;  %v1070_v63 = vrot.slane %v2221_v29, 4 }
 0x14f   : > { %v1002_v3 = vunpack.c.l.b16 %v994_v2  ;;  %v1020_v13 = vrot.slane %v1639_v57, 1  ;;  %v1038_v16 = vrot.slane %v1639_v57, 3  ;;  %v1029_v15 = vrot.slane %v1639_v57, 2 }
 0x150   : > { %v983_v4 = vpop.f32.mrf.mxu0  ;;  %v1047_v18 = vrot.slane %v1639_v57, 4  ;;  %v1057_v34 = vrot.slane %v1639_v57, 5  ;;  %v1077_v47 = vrot.slane %v1639_v57, 7  ;;  %v1067_v17 = vrot.slane %v1639_v57, 6 }
 0x151   : > { %v992_v6 = vpack.c.bf16 %v983_v4, %v983_v4  ;;  %v2223_v7 = vunpack.i.l.s16 %v1002_v3 }
 0x153   : > { %v1000_v8 = vunpack.c.l.b16 %v992_v6  ;;  %v1024_v14 = vrot.slane %v2223_v7, 6  ;;  %v1033_v26 = vrot.slane %v2223_v7, 7  ;;  %v1052_v41 = vrot.slane %v2223_v7, 1 }
 0x154   : > { %v1062_v43 = vrot.slane %v2223_v7, 2  ;;  %v1015_v50 = vrot.slane %v2223_v7, 5  ;;  %v1082_v48 = vrot.slane %v2223_v7, 4  ;;  %v1072_v3 = vrot.slane %v2223_v7, 3 }
 0x155   : > { %v1640_v9 = vunpack.i.l.s16 %v1000_v8 }
 0x157   : > { %v1021_v54 = vsel %vm889_vm2, %v1640_v9, %v1020_v13  ;;  %v1039_v51 = vrot.slane %v1640_v9, 2  ;;  %v1030_v24 = vrot.slane %v1640_v9, 1  ;;  %v1048_v10 = vrot.slane %v1640_v9, 3 }
 0x158   : > { %v1023_v23 = vsel %vm892_vm3, %v1022_v32, %v1021_v54  ;;  %v1058_v12 = vrot.slane %v1640_v9, 4  ;;  %v1011_v27 = vrot.slane %v1640_v9, 7  ;;  %v1078_v56 = vrot.slane %v1640_v9, 6 }
 0x159   : > { %v1025_v28 = vsel %vm895_vm4, %v1024_v14, %v1023_v23  ;;  %v1040_v31 = vsel %vm889_vm2, %v1039_v51, %v1038_v16  ;;  %v1031_v45 = vsel %vm889_vm2, %v1030_v24, %v1029_v15  ;;  %v1049_v61 = vsel %vm889_vm2, %v1048_v10, %v1047_v18 }
 0x15a   : > { %v1026_v33 = vpack.c.b16 %v1025_v28, %v1025_v28  ;;  %v1042_v11 = vsel %vm892_vm3, %v1041_v1, %v1040_v31  ;;  %v1032_v5 = vsel %vm892_vm3, %v2221_v29, %v1031_v45  ;;  %v1059_v36 = vsel %vm889_vm2, %v1058_v12, %v1057_v34  ;;  %v1153_v28 = vld [vmem:[%s2565_s3] sm:$0xff] }
 0x15b   : > { %v1043_v35 = vsel %vm895_vm4, %v2223_v7, %v1042_v11  ;;  %v1034_v0 = vsel %vm895_vm4, %v1033_v26, %v1032_v5  ;;  %v1051_v59 = vsel %vm892_vm3, %v1050_v44, %v1049_v61  ;;  %v1012_v40 = vsel %vm889_vm2, %v1011_v27, %v1639_v57 }
 0x15c   : > { %1027 = vrot.lane.b32.xlu2 %v1026_v33, %s1868_s21  ;;  %v1044_v37 = vpack.c.b16 %v1043_v35, %v1043_v35  ;;  %v1035_v49 = vpack.c.b16 %v1034_v0, %v1034_v0  ;;  %v1061_v46 = vsel %vm892_vm3, %v1060_v38, %v1059_v36  ;;  %v1014_v55 = vsel %vm892_vm3, %v1013_v39, %v1012_v40  ;;  %s1881_s21 = smov 118   ;;  %v1152_v40 = vld [vmem:[%s2564_s2] sm:$0xf] }
 0x15d   : > { %v1053_v21 = vsel %vm895_vm4, %v1052_v41, %v1051_v59  ;;  %v1068_v20 = vrot.slane %v1640_v9, 5  ;;  %v1063_v52 = vsel %vm895_vm4, %v1062_v43, %v1061_v46  ;;  %v1016_v19 = vsel %vm895_vm4, %v1015_v50, %v1014_v55  ;;  %v1801_v55 = vld [vmem:[%s2568_s6] ss:$0 sm:$0xff] }
 0x15e   : > { %1045 = vrot.lane.b32.xlu1 %v1044_v37, %s1869_s22  ;;  %1036 = vrot.lane.b32.xlu0 %v1035_v49, %s1870_s23  ;;  %v1079_v25 = vsel %vm889_vm2, %v1078_v56, %v1077_v47  ;;  %v1054_v60 = vpack.c.b16 %v1053_v21, %v1053_v21  ;;  %v1064_v53 = vpack.c.b16 %v1063_v52, %v1063_v52  ;;  %s1882_s22 = smov 126   ;;  %v1883_v31 = vmov 0   ;;  %s1884_s23 = smov 11  }
 0x15f   : > { %v1069_v22 = vsel %vm889_vm2, %v1068_v20, %v1067_v17  ;;  %v1017_v30 = vpack.c.b16 %v1016_v19, %v1016_v19  ;;  %v1081_v62 = vsel %vm892_vm3, %v1080_v42, %v1079_v25  ;;  %vm1109_vm2 = vcmask 654336   ;;  %1799 = vset.pattern.permute.xlu2 %v1883_v31  ;;  %1800 = vset.pattern.permute.xlu0 %v1883_v31 }
 0x160   : > { %v1071_v2 = vsel %vm892_vm3, %v1070_v63, %v1069_v22  ;;  %v1083_v58 = vsel %vm895_vm4, %v1082_v48, %v1081_v62  ;;  %vm1112_vm3 = vcmask 736256   ;;  %v1230_v22 = vld [vmem:[%s2567_s5] sm:$0xff] }
 0x161   : > { %v1073_v4 = vsel %vm895_vm4, %v1072_v3, %v1071_v2  ;;  %v1084_v57 = vpack.c.b16 %v1083_v58, %v1083_v58  ;;  %vm1134_vm4 = vcmask 1041408  }
 0x162   : > { %v1074_v6 = vpack.c.b16 %v1073_v4, %v1073_v4 }
 0x164   : > { %1055 = vrot.lane.b32.xlu2 %v1054_v60, %s1871_s29 }
 0x166   : > { %1065 = vrot.lane.b32.xlu0 %v1064_v53, %s1872_s8  ;;  %1018 = vrot.lane.b32.xlu1 %v1017_v30, %s1873_s9  ;;  %s1889_s9 = smov 78  }
 0x16c   : > { %1085 = vrot.lane.b32.xlu2 %v1084_v57, %s1874_s13 }
 0x16e   : > { %1075 = vrot.lane.b32.xlu1 %v1074_v6, %s1875_s14  ;;  %s1652_s14 = sshll.u32 %s1953_s28, 6 }
 0x16f   : > { %s1528_s8 = scalar_lea.hbm %s2569_s7, %s1652_s14 }
 0x170   : > { %s1531_s28 = sshll.u32 %s1528_s8, 4  ;;  %s1532_s28 = int_to_ptr.hbm [resolvable:$true] %s1531_s28 }
 0x1b6   : > { %v1028_v29 = vpop.permute.xlu2 %1027 }
 0x1be   : > { %v1056_v9 = vpop.permute.xlu2 %1055 }
 0x1c6   : > { %v1086_v51 = vpop.permute.xlu2 %1085 }
 0x1d0   : > { %v1046_v8 = vpop.permute.xlu1 %1045  ;;  %v1037_v32 = vpop.permute.xlu0 %1036 }
 0x1d8   : > { %v1019_v13 = vpop.permute.xlu1 %1018  ;;  %v1066_v18 = vpop.permute.xlu0 %1065 }
 0x1d9   : > { %v1090_v16 = vsel %vm1087_vm10, 0, %v1019_v13  ;;  %vm1236_vm10 = vcmask 588800  }
 0x1da   : > { %v1093_v1 = vsel %vm1091_vm11, %v1090_v16, %v1028_v29  ;;  %vm1448_vm11 = vcmask 1040384  }
 0x1db   : > { %v1096_v7 = vsel %vm1094_vm12, %v1093_v1, %v1037_v32  ;;  %v1229_v32 = vld [vmem:[%s2566_s4] sm:$0xf]  ;;  %vm1465_vm12 = vcmask 1042432  }
 0x1dc   : > { %v1099_v14 = vsel %vm1097_vm13, %v1096_v7, %v1046_v8  ;;  %vm1482_vm13 = vcmask 1044480  }
 0x1dd   : > { %v1102_v15 = vsel %vm1100_vm14, %v1099_v14, %v1056_v9  ;;  %vm1507_vm14 = vcmask 64512  }
 0x1de   : > { %v1105_v34 = vsel %vm1103_vm15, %v1102_v15, %v1066_v18 }
 0x1e0   : > { %v1076_v54 = vpop.permute.xlu1 %1075 }
 0x1e1   : > { %v1108_v24 = vsel %vm1106_vm1, %v1105_v34, %v1076_v54 }
 0x1e2   : > { %v1111_v10 = vsel %vm1109_vm2, %v1108_v24, %v1086_v51 }
 0x1e3   : > { %v1113_v23 = vsel %vm1112_vm3, %v1111_v10, 0 }
 0x1e4   : > { %1124 = vrot.lane.b32.xlu1 %v1113_v23, %s1876_s15  ;;  %1132 = vrot.lane.b32.xlu0 %v1113_v23, %s1877_s16  ;;  %v1115_v26 = vrot.slane %v1113_v23, 6  ;;  %v1121_v12 = vrot.slane %v1113_v23, 2  ;;  %v1118_v27 = vrot.slane %v1113_v23, 4 }
 0x1e6   : > { %1126 = vrot.lane.b32.xlu2 %v1115_v26, %s1878_s17 }
 0x1ec   : > { %1130 = vrot.lane.b32.xlu1 %v1121_v12, %s1879_s19  ;;  %1128 = vrot.lane.b32.xlu0 %v1118_v27, %s1880_s20 }
 0x1ee   : > { %1116 = vrot.lane.b32.xlu2 %v1115_v26, %s1866_s18 }
 0x1f4   : > { %1122 = vrot.lane.b32.xlu1 %v1121_v12, %s1881_s21  ;;  %1119 = vrot.lane.b32.xlu0 %v1118_v27, %s1882_s22 }
 0x1f6   : > { %1156 = vperm.xlu2 %1799, %v1153_v28  }
 0x240   : > { %v1127_v11 = vpop.permute.xlu2 %1126 }
 0x248   : > { %v1117_v38 = vpop.permute.xlu2 %1116 }
 0x249   : > { %v1136_v37 = vsel %vm1134_vm4, %v1113_v23, %v1117_v38 }
 0x250   : > { %v1157_v56 = vpop.permute.xlu2 %1156 }
 0x256   : > { %v1125_v45 = vpop.permute.xlu1 %1124  ;;  %v1133_v61 = vpop.permute.xlu0 %1132 }
 0x257   : > { %v1164_v33 = vsel %vm1134_vm4, %v1133_v61, 0  ;;  %v1146_v5 = vsel %vm1134_vm4, %v1125_v45, %v1127_v11 }
 0x258   : > { %1171 = vmatpush.bf16.msra.mxu1 %v1164_v33 }
 0x25e   : > { %v1131_v44 = vpop.permute.xlu1 %1130  ;;  %v1129_v35 = vpop.permute.xlu0 %1128 }
 0x25f   : > { %v1148_v0 = vsel %vm1137_vm5, %v1146_v5, %v1129_v35 }
 0x260   : > { %v1150_v36 = vsel %vm1140_vm6, %v1148_v0, %v1131_v44 }
 0x261   : > { %1172 = vmatpush.bf16.msra.mxu1 %v1150_v36 }
 0x266   : > { %v1123_v49 = vpop.permute.xlu1 %1122  ;;  %v1120_v59 = vpop.permute.xlu0 %1119 }
 0x267   : > { %v1139_v39 = vsel %vm1137_vm5, %v1136_v37, %v1120_v59 }
 0x268   : > { %v1142_v41 = vsel %vm1140_vm6, %v1139_v39, %v1123_v49 }
 0x269   : > { %1173 = vmatpush.bf16.msra.mxu1 %v1142_v41 }
 0x26c   : > { %1643 = vmatmul.msk.bf16.vlgmr.msra.gmra.mxu1 %vm1159_vm7, %v1152_v40 }
 0x2e9   : > { %v1175_v46 = vpop.f32.mrf.mxu1 }
 0x2ea   : > { %v1176_v47 = vadd.f32 %v1175_v46, %v1157_v56 }
 0x2ec   : > { %v1179_v21 = vmax.f32 %v1176_v47, 0.0 }
 0x2ee   : > { %v1184_v43 = vmul.f32 %v1801_v55, %v1179_v21 }
 0x2f0   : > { %v1185_v50 = vpack.c.bf16 %v1184_v43, %v1184_v43 }
 0x2f1   : > { %v1177_v20 = vpop.f32.mrf.mxu1 }
 0x2f2   : > { %v1187_v52 = vunpack.c.l.b16 %v1185_v50 }
 0x2f4   : > { %v1188_v19 = vpack.c.b16 %v1187_v52, %v1187_v52 }
 0x2f6   : > { %1189 = vrot.lane.b32.xlu0 %v1188_v19, %s1884_s23 }
 0x368   : > { %v1190_v25 = vpop.permute.xlu0 %1189 }
 0x369   : > { %v1193_v17 = vsel %vm1191_vm8, 0, %v1190_v25 }
 0x36a   : > { %v1195_v60 = vsel %vm1194_vm9, %v1193_v17, 0 }
 0x36b   : > { %1208 = vrot.lane.b32.xlu2 %v1195_v60, %s1880_s20  ;;  %1212 = vrot.lane.b32.xlu1 %v1195_v60, %s1877_s16  ;;  %v1197_v42 = vrot.slane %v1195_v60, 4  ;;  %s1885_s16 = smov 88  }
 0x36d   : > { %1210 = vrot.lane.b32.xlu0 %v1197_v42, %s1879_s19  ;;  %s1887_s19 = smov 58  }
 0x373   : > { %1204 = vrot.lane.b32.xlu1 %v1195_v60, %s1876_s15  ;;  %1206 = vrot.lane.b32.xlu2 %v1197_v42, %s1878_s17  ;;  %s1886_s17 = smov 98  }
 0x375   : > { %1200 = vrot.lane.b32.xlu0 %v1195_v60, %s1882_s22  ;;  %s1888_s22 = smov 68  }
 0x37b   : > { %1202 = vrot.lane.b32.xlu1 %v1197_v42, %s1881_s21  ;;  %1198 = vrot.lane.b32.xlu2 %v1197_v42, %s1866_s18 }
 0x37d   : > { %1233 = vperm.xlu0 %1800, %v1230_v22  }
 0x3c5   : > { %v1209_v53 = vpop.permute.xlu2 %1208 }
 0x3cd   : > { %v1207_v2 = vpop.permute.xlu2 %1206 }
 0x3d5   : > { %v1199_v29 = vpop.permute.xlu2 %1198 }
 0x3d6   : > { %v1215_v8 = vsel %vm1137_vm5, %v1195_v60, %v1199_v29 }
 0x3dd   : > { %v1213_v30 = vpop.permute.xlu1 %1212 }
 0x3de   : > { %v1241_v62 = vsel %vm1137_vm5, %v1213_v30, 0 }
 0x3df   : > { %1246 = vmatpush.bf16.msra.mxu2 %v1241_v62  ;;  %v1211_v63 = vpop.permute.xlu0 %1210 }
 0x3e0   : > { %v1227_v48 = vsel %vm1137_vm5, %v1209_v53, %v1211_v63 }
 0x3e3   : > { %1247 = vmatpush.bf16.msra.mxu2 %v1227_v48 }
 0x3e5   : > { %v1205_v58 = vpop.permute.xlu1 %1204 }
 0x3e6   : > { %v1223_v3 = vsel %vm1137_vm5, %v1205_v58, %v1207_v2 }
 0x3e7   : > { %1248 = vmatpush.bf16.msra.mxu2 %v1223_v3  ;;  %v1201_v4 = vpop.permute.xlu0 %1200 }
 0x3ed   : > { %v1203_v57 = vpop.permute.xlu1 %1202 }
 0x3ee   : > { %v1219_v6 = vsel %vm1137_vm5, %v1201_v4, %v1203_v57 }
 0x3ef   : > { %1249 = vmatpush.bf16.msra.mxu2 %v1219_v6  ;;  %v1234_v9 = vpop.permute.xlu0 %1233 }
 0x3f3   : > { %1250 = vmatpush.bf16.msra.mxu2 %v1215_v8 }
 0x3f6   : > { %1644 = vmatmul.msk.bf16.vlgmr.msra.gmra.mxu2 %vm1236_vm10, %v1229_v32 }
 0x479   : > { %v1252_v13 = vpop.f32.mrf.mxu2 }
 0x47a   : > { %v1253_v16 = vadd.f32 %v1252_v13, %v1234_v9 }
 0x47c   : > { %v2308_v1 = vmax.f32 %v1253_v16, 0.0 }
 0x47e   : > { %v1272_v7 = vperm.slane %v2308_v1, 0  ;;  %v1261_v15 = vrot.slane %v2308_v1, 4  ;;  %v1258_v18 = vrot.slane %v2308_v1, 1  ;;  %v1264_v51 = vrot.slane %v2308_v1, 7 }
 0x47f   : > { %v1260_v24 = vrot.slane %v2308_v1, 3  ;;  %v1259_v10 = vrot.slane %v2308_v1, 2  ;;  %v1263_v27 = vrot.slane %v2308_v1, 6  ;;  %v1262_v28 = vrot.slane %v2308_v1, 5 }
 0x480   : > { %1352 = vrot.lane.b32.xlu2 %v1272_v7, %s1885_s16  ;;  %1328 = vrot.lane.b32.xlu0 %v1272_v7, %s1886_s17  ;;  %v2321_v34 = vperm.slane %v1261_v15, 0  ;;  %v1273_v54 = vperm.slane %v1258_v18, 0  ;;  %v2332_v23 = vperm.slane %v1264_v51, 0 }
 0x481   : > { %1280 = vrot.lane.b32.xlu1 %v1272_v7, %s1881_s21  ;;  %v1254_v14 = vpop.f32.mrf.mxu2  ;;  %v2334_v26 = vperm.slane %v1260_v24, 0  ;;  %v2338_v12 = vperm.slane %v1259_v10, 0  ;;  %v2348_v31 = vperm.slane %v1263_v27, 0  ;;  %v2352_v45 = vperm.slane %v1262_v28, 0 }
 0x488   : > { %1424 = vrot.lane.b32.xlu2 %v1272_v7, %s1887_s19  ;;  %1400 = vrot.lane.b32.xlu0 %v1272_v7, %s1888_s22 }
 0x489   : > { %1304 = vrot.lane.b32.xlu1 %v1272_v7, %s1880_s20 }
 0x490   : > { %1288 = vrot.lane.b32.xlu0 %v2321_v34, %s1881_s21  ;;  %1282 = vrot.lane.b32.xlu2 %v1273_v54, %s1881_s21 }
 0x491   : > { %1376 = vrot.lane.b32.xlu1 %v1272_v7, %s1889_s9 }
 0x498   : > { %1294 = vrot.lane.b32.xlu0 %v2332_v23, %s1881_s21  ;;  %1286 = vrot.lane.b32.xlu2 %v2334_v26, %s1881_s21 }
 0x499   : > { %1284 = vrot.lane.b32.xlu1 %v2338_v12, %s1881_s21 }
 0x4a0   : > { %1308 = vrot.lane.b32.xlu0 %v2338_v12, %s1880_s20  ;;  %1292 = vrot.lane.b32.xlu2 %v2348_v31, %s1881_s21 }
 0x4a1   : > { %1290 = vrot.lane.b32.xlu1 %v2352_v45, %s1881_s21 }
 0x4a8   : > { %1314 = vrot.lane.b32.xlu0 %v2352_v45, %s1880_s20  ;;  %1306 = vrot.lane.b32.xlu2 %v1273_v54, %s1880_s20 }
 0x4a9   : > { %1310 = vrot.lane.b32.xlu1 %v2334_v26, %s1880_s20 }
 0x4b0   : > { %1334 = vrot.lane.b32.xlu0 %v2334_v26, %s1886_s17  ;;  %1312 = vrot.lane.b32.xlu2 %v2321_v34, %s1880_s20 }
 0x4b1   : > { %1316 = vrot.lane.b32.xlu1 %v2348_v31, %s1880_s20 }
 0x4b8   : > { %1340 = vrot.lane.b32.xlu0 %v2348_v31, %s1886_s17  ;;  %1318 = vrot.lane.b32.xlu2 %v2332_v23, %s1880_s20  ;;  %s269_s20 = sand.u32 1, %s1856_s25  }
 0x4b9   : > { %1330 = vrot.lane.b32.xlu1 %v1273_v54, %s1886_s17  ;;  %s1598_s21 = sshll.u32 %s269_s20, 6  ;;  %s1517_s15 = scalar_lea.sflag [#allocation3], %s269_s20 }
 0x4ba   : > { %s2444_s13 = scalar_lea.vmem [#allocation2], %s1598_s21 }
 0x4bb   : > { %s1529_s18 = sshll.u32 %s2444_s13, 4  ;;  %s1530_s18 = int_to_ptr.vmem [resolvable:$true] %s1529_s18 }
 0x4c0   : > { %1354 = vrot.lane.b32.xlu0 %v1273_v54, %s1885_s16  ;;  %1332 = vrot.lane.b32.xlu2 %v2338_v12, %s1886_s17 }
 0x4c1   : > { %1336 = vrot.lane.b32.xlu1 %v2321_v34, %s1886_s17 }
 0x4c8   : > { %1360 = vrot.lane.b32.xlu0 %v2321_v34, %s1885_s16  ;;  %1338 = vrot.lane.b32.xlu2 %v2352_v45, %s1886_s17 }
 0x4c9   : > { %1342 = vrot.lane.b32.xlu1 %v2332_v23, %s1886_s17 }
 0x4d0   : > { %1366 = vrot.lane.b32.xlu0 %v2332_v23, %s1885_s16  ;;  %1358 = vrot.lane.b32.xlu2 %v2334_v26, %s1885_s16 }
 0x4d1   : > { %1356 = vrot.lane.b32.xlu1 %v2338_v12, %s1885_s16 }
 0x4d8   : > { %1380 = vrot.lane.b32.xlu0 %v2338_v12, %s1889_s9  ;;  %1364 = vrot.lane.b32.xlu2 %v2348_v31, %s1885_s16 }
 0x4d9   : > { %1362 = vrot.lane.b32.xlu1 %v2352_v45, %s1885_s16  ;;  %s1816_s16 = sshra.s32 %s1532_s28, 4  ;;  %s1817_s16 = int_to_ptr.hbm [resolvable:$true] %s1816_s16 }
 0x4da   : > { %v1353_v61 = vpop.permute.xlu2 %1352  ;;  %s1818_s17 = scalar_lea.hbm %s1817_s16, 64  ;;  %p1823_p0 = scmp.lt.s32.totalorder %s1817_s16, %s2569_s7 }
 0x4db   : > { %p1819_p11 = scmp.ne.s32.totalorder %s1817_s16, %s1818_s17 }
 0x4dd   : > { %p1820_p12 = pnand %p1819_p11, %p1970_p5 }
 0x4df   : > { %p1821_p13 = pneg %p1820_p12 }
 0x4e0   : > { %1386 = vrot.lane.b32.xlu0 %v2352_v45, %s1889_s9  ;;  %1378 = vrot.lane.b32.xlu2 %v1273_v54, %s1889_s9 }
 0x4e1   : > { %1382 = vrot.lane.b32.xlu1 %v2334_v26, %s1889_s9 }
 0x4e2   : > { %v1425_v33 = vpop.permute.xlu2 %1424 }
 0x4e8   : > { %1406 = vrot.lane.b32.xlu0 %v2334_v26, %s1888_s22  ;;  %1384 = vrot.lane.b32.xlu2 %v2321_v34, %s1889_s9 }
 0x4e9   : > { %1388 = vrot.lane.b32.xlu1 %v2348_v31, %s1889_s9 }
 0x4ea   : > { %v1283_v11 = vpop.permute.xlu2 %1282 }
 0x4eb   : > { %v1450_v5 = vsel %vm1448_vm11, %v1258_v18, %v1283_v11 }
 0x4f0   : > { %1412 = vrot.lane.b32.xlu0 %v2348_v31, %s1888_s22  ;;  %1390 = vrot.lane.b32.xlu2 %v2332_v23, %s1889_s9  ;;  %s1822_s9 = scalar_lea.hbm %s2569_s7, 128 }
 0x4f1   : > { %1402 = vrot.lane.b32.xlu1 %v1273_v54, %s1888_s22  ;;  %p1824_p1 = scmp.lt.s32.totalorder %s1822_s9, %s1818_s17 }
 0x4f2   : > { %v1329_v44 = vpop.permute.xlu0 %1328  ;;  %v1287_v35 = vpop.permute.xlu2 %1286 }
 0x4f3   : > { %v1281_v0 = vpop.permute.xlu1 %1280  ;;  %v1452_v36 = vsel %vm1448_vm11, %v1260_v24, %v1287_v35  ;;  %p1825_p2 = por %p1824_p1, %p1823_p0 }
 0x4f4   : > { %v1449_v39 = vsel %vm1448_vm11, %v2308_v1, %v1281_v0 }
 0x4f5   : > { %p1826_p3 = pnand %p1825_p2, %p1821_p13 }
 0x4f8   : > { %1426 = vrot.lane.b32.xlu0 %v1273_v54, %s1887_s19  ;;  %1404 = vrot.lane.b32.xlu2 %v2338_v12, %s1888_s22 }
 0x4f9   : > { %1408 = vrot.lane.b32.xlu1 %v2321_v34, %s1888_s22 }
 0x4fa   : > { %v1401_v38 = vpop.permute.xlu0 %1400  ;;  %v1293_v37 = vpop.permute.xlu2 %1292 }
 0x4fb   : > { %v1305_v49 = vpop.permute.xlu1 %1304  ;;  %v1455_v59 = vsel %vm1448_vm11, %v1263_v27, %v1293_v37 }
 0x4fc   : > { %v1457_v41 = vsel %vm1134_vm4, %v1449_v39, %v1305_v49 }
 0x4fd   : > { %v1466_v40 = vsel %vm1465_vm12, %v1457_v41, %v1329_v44 }
 0x4fe   : > { %v1474_v55 = vsel %vm1137_vm5, %v1466_v40, %v1353_v61 }
 0x500   : > { %1432 = vrot.lane.b32.xlu0 %v2321_v34, %s1887_s19  ;;  %1410 = vrot.lane.b32.xlu2 %v2352_v45, %s1888_s22 }
 0x501   : > { %1414 = vrot.lane.b32.xlu1 %v2332_v23, %s1888_s22 }
 0x502   : > { %v1289_v56 = vpop.permute.xlu0 %1288  ;;  %v1307_v46 = vpop.permute.xlu2 %1306 }
 0x503   : > { %v1377_v47 = vpop.permute.xlu1 %1376  ;;  %v1453_v21 = vsel %vm1448_vm11, %v1261_v15, %v1289_v56  ;;  %v1458_v43 = vsel %vm1134_vm4, %v1450_v5, %v1307_v46 }
 0x504   : > { %v1483_v50 = vsel %vm1482_vm13, %v1474_v55, %v1377_v47 }
 0x505   : > { %v1491_v20 = vsel %vm1140_vm6, %v1483_v50, %v1401_v38 }
 0x506   : > { %v1499_v52 = vsel %vm965_vm0, %v1491_v20, %v1425_v33 }
 0x507   : > { %1508 = vst.msk [vmem:[%s2444_s13] sm:$0xff] %vm1507_vm14, %v1499_v52 }
 0x508   : > { %1438 = vrot.lane.b32.xlu0 %v2332_v23, %s1887_s19  ;;  %1430 = vrot.lane.b32.xlu2 %v2334_v26, %s1887_s19 }
 0x509   : > { %1428 = vrot.lane.b32.xlu1 %v2338_v12, %s1887_s19 }
 0x50a   : > { %v1295_v19 = vpop.permute.xlu0 %1294  ;;  %v1313_v25 = vpop.permute.xlu2 %1312 }
 0x50b   : > { %v1456_v17 = vsel %vm1448_vm11, %v1264_v51, %v1295_v19  ;;  %v1285_v60 = vpop.permute.xlu1 %1284  ;;  %v1461_v42 = vsel %vm1134_vm4, %v1453_v21, %v1313_v25 }
 0x50c   : > { %v1451_v22 = vsel %vm1448_vm11, %v1259_v10, %v1285_v60 }
 0x510   : > { %1436 = vrot.lane.b32.xlu2 %v2348_v31, %s1887_s19 }
 0x511   : > { %1434 = vrot.lane.b32.xlu1 %v2352_v45, %s1887_s19 }
 0x512   : > { %v1309_v53 = vpop.permute.xlu0 %1308  ;;  %v1319_v30 = vpop.permute.xlu2 %1318 }
 0x513   : > { %v1459_v62 = vsel %vm1134_vm4, %v1451_v22, %v1309_v53  ;;  %v1291_v63 = vpop.permute.xlu1 %1290  ;;  %v1464_v48 = vsel %vm1134_vm4, %v1456_v17, %v1319_v30 }
 0x514   : > { %v1454_v2 = vsel %vm1448_vm11, %v1262_v28, %v1291_v63 }
 0x51a   : > { %v1315_v58 = vpop.permute.xlu0 %1314  ;;  %v1333_v3 = vpop.permute.xlu2 %1332 }
 0x51b   : > { %v1462_v4 = vsel %vm1134_vm4, %v1454_v2, %v1315_v58  ;;  %v1311_v57 = vpop.permute.xlu1 %1310  ;;  %v2472_v6 = vsel %vm1465_vm12, %v1459_v62, %v1333_v3 }
 0x51c   : > { %v1460_v29 = vsel %vm1134_vm4, %v1452_v36, %v1311_v57 }
 0x522   : > { %v1335_v8 = vpop.permute.xlu0 %1334  ;;  %v1339_v32 = vpop.permute.xlu2 %1338 }
 0x523   : > { %v1469_v9 = vsel %vm1465_vm12, %v1460_v29, %v1335_v8  ;;  %v1317_v13 = vpop.permute.xlu1 %1316  ;;  %v2477_v16 = vsel %vm1465_vm12, %v1462_v4, %v1339_v32 }
 0x524   : > { %v1463_v1 = vsel %vm1134_vm4, %v1455_v59, %v1317_v13 }
 0x52a   : > { %v1341_v7 = vpop.permute.xlu0 %1340  ;;  %v1359_v14 = vpop.permute.xlu2 %1358 }
 0x52b   : > { %v1472_v15 = vsel %vm1465_vm12, %v1463_v1, %v1341_v7  ;;  %v1331_v18 = vpop.permute.xlu1 %1330  ;;  %v1477_v37 = vsel %vm1137_vm5, %v1469_v9, %v1359_v14 }
 0x52c   : > { %v1467_v34 = vsel %vm1465_vm12, %v1458_v43, %v1331_v18 }
 0x532   : > { %v1355_v54 = vpop.permute.xlu0 %1354  ;;  %v1365_v51 = vpop.permute.xlu2 %1364 }
 0x533   : > { %v1337_v24 = vpop.permute.xlu1 %1336  ;;  %v1475_v46 = vsel %vm1137_vm5, %v1467_v34, %v1355_v54  ;;  %v1480_v55 = vsel %vm1137_vm5, %v1472_v15, %v1365_v51 }
 0x534   : > { %v1470_v10 = vsel %vm1465_vm12, %v1461_v42, %v1337_v24 }
 0x53a   : > { %v1361_v23 = vpop.permute.xlu0 %1360  ;;  %v1379_v26 = vpop.permute.xlu2 %1378 }
 0x53b   : > { %v1343_v12 = vpop.permute.xlu1 %1342  ;;  %v1484_v47 = vsel %vm1482_vm13, %v1475_v46, %v1379_v26  ;;  %v1478_v60 = vsel %vm1137_vm5, %v1470_v10, %v1361_v23 }
 0x53c   : > { %v1473_v27 = vsel %vm1465_vm12, %v1464_v48, %v1343_v12 }
 0x542   : > { %v1367_v28 = vpop.permute.xlu0 %1366  ;;  %v1385_v31 = vpop.permute.xlu2 %1384 }
 0x543   : > { %v1357_v45 = vpop.permute.xlu1 %1356  ;;  %v1487_v42 = vsel %vm1482_vm13, %v1478_v60, %v1385_v31  ;;  %v1481_v63 = vsel %vm1137_vm5, %v1473_v27, %v1367_v28 }
 0x544   : > { %v1476_v48 = vsel %vm1137_vm5, %v2472_v6, %v1357_v45 }
 0x54a   : > { %v1381_v61 = vpop.permute.xlu0 %1380  ;;  %v1391_v33 = vpop.permute.xlu2 %1390 }
 0x54b   : > { %v1363_v11 = vpop.permute.xlu1 %1362  ;;  %v1490_v2 = vsel %vm1482_vm13, %v1481_v63, %v1391_v33  ;;  %v1485_v58 = vsel %vm1482_vm13, %v1476_v48, %v1381_v61 }
 0x54c   : > { %v1479_v6 = vsel %vm1137_vm5, %v2477_v16, %v1363_v11 }
 0x552   : > { %v1387_v5 = vpop.permute.xlu0 %1386  ;;  %v1405_v44 = vpop.permute.xlu2 %1404 }
 0x553   : > { %v1383_v35 = vpop.permute.xlu1 %1382  ;;  %v1493_v57 = vsel %vm1140_vm6, %v1485_v58, %v1405_v44  ;;  %v1488_v9 = vsel %vm1482_vm13, %v1479_v6, %v1387_v5 }
 0x554   : > { %v1486_v49 = vsel %vm1482_vm13, %v1477_v37, %v1383_v35 }
 0x55a   : > { %v1407_v0 = vpop.permute.xlu0 %1406  ;;  %v1411_v36 = vpop.permute.xlu2 %1410 }
 0x55b   : > { %v1389_v38 = vpop.permute.xlu1 %1388  ;;  %v1494_v59 = vsel %vm1140_vm6, %v1486_v49, %v1407_v0  ;;  %v1496_v13 = vsel %vm1140_vm6, %v1488_v9, %v1411_v36 }
 0x55c   : > { %v1489_v21 = vsel %vm1482_vm13, %v1480_v55, %v1389_v38 }
 0x562   : > { %v1413_v39 = vpop.permute.xlu0 %1412  ;;  %v1431_v41 = vpop.permute.xlu2 %1430 }
 0x563   : > { %v1403_v40 = vpop.permute.xlu1 %1402  ;;  %v1502_v56 = vsel %vm965_vm0, %v1494_v59, %v1431_v41  ;;  %v1497_v43 = vsel %vm1140_vm6, %v1489_v21, %v1413_v39 }
 0x564   : > { %1511 = vst.msk [vmem:[%s2444_s13 + $0x18] sm:$0xff] %vm1507_vm14, %v1502_v56  ;;  %v1492_v50 = vsel %vm1140_vm6, %v1484_v47, %v1403_v40 }
 0x56a   : > { %v1427_v20 = vpop.permute.xlu0 %1426  ;;  %v1437_v52 = vpop.permute.xlu2 %1436 }
 0x56b   : > { %v1500_v19 = vsel %vm965_vm0, %v1492_v50, %v1427_v20  ;;  %v1409_v25 = vpop.permute.xlu1 %1408  ;;  %v1505_v17 = vsel %vm965_vm0, %v1497_v43, %v1437_v52 }
 0x56c   : > { %1509 = vst.msk [vmem:[%s2444_s13 + $0x8] sm:$0xff] %vm1507_vm14, %v1500_v19  ;;  %v1495_v22 = vsel %vm1140_vm6, %v1487_v42, %v1409_v25 }
 0x56d   : > { %1514 = vst.msk [vmem:[%s2444_s13 + $0x30] sm:$0xff] %vm1507_vm14, %v1505_v17 }
 0x572   : > { %v1433_v53 = vpop.permute.xlu0 %1432 }
 0x573   : > { %v1503_v30 = vsel %vm965_vm0, %v1495_v22, %v1433_v53  ;;  %v1415_v62 = vpop.permute.xlu1 %1414 }
 0x574   : > { %1512 = vst.msk [vmem:[%s2444_s13 + $0x20] sm:$0xff] %vm1507_vm14, %v1503_v30  ;;  %v1498_v3 = vsel %vm1140_vm6, %v1490_v2, %v1415_v62 }
 0x57a   : > { %v1439_v4 = vpop.permute.xlu0 %1438 }
 0x57b   : > { %v1506_v29 = vsel %vm965_vm0, %v1498_v3, %v1439_v4  ;;  %v1429_v8 = vpop.permute.xlu1 %1428 }
 0x57c   : > { %1515 = vst.msk [vmem:[%s2444_s13 + $0x38] sm:$0xff] %vm1507_vm14, %v1506_v29  ;;  %v1501_v32 = vsel %vm965_vm0, %v1493_v57, %v1429_v8 }
 0x57d   : > { %1510 = vst.msk [vmem:[%s2444_s13 + $0x10] sm:$0xff] %vm1507_vm14, %v1501_v32 }
 0x583   : > { %v1435_v1 = vpop.permute.xlu1 %1434 }
 0x584   : > { %v1504_v7 = vsel %vm965_vm0, %v1496_v13, %v1435_v1 }
 0x585   : > { %1513 = vst.msk [vmem:[%s2444_s13 + $0x28] sm:$0xff] %vm1507_vm14, %v1504_v7 }
 0x586   : > { %1829 = shalt.err (!%p1826_p3)
}
 0x587   : > { %s1890_s20 = smov 128   ;;  %s1891_s13 = smov 8  }
 0x588   : > { %1654 = dma.vmem_to_hbm [thread:$0]  (%p1970_p5), %s1530_s18, 1024, %s1532_s28, %s1517_s15, %s1890_s20, %s1890_s20, %s1891_s13  }
 0x589 PF: > { %p1660_p4 = scmp.ge.s32.totalorder %s1864_s27, 2  ;;  %s1546_s23 = sand.u32 1, %s1852_s24  }
 0x58a   : > { %s1547_s29 = scalar_lea.sflag [#allocation3], %s1546_s23 }
 0x58b   : > { %p1657_p7 = pnand %p1660_p4, %p1974_p6 }
 0x58d   : > { %p1658_p8 = pneg %p1657_p7 }
 0x58f   : > { %1847 = dma.done.wait (%p1658_p8), %s1547_s29, 1024  }
 0x590   : > { %1849 = vsyncadd (%p1658_p8), %s1547_s29, 4294966272  ;;  %p17_p9 = scmp.ge.s32.totalorder %s1957_s30, 4   ;;  %s2572_s24 = smov %s1856_s25 }
 0x591   : > { %s2573_s25 = smov %s1860_s26  ;;  %s2574_s26 = smov %s1968_s10 }
 0x592   : > { %s2575_s27 = smov %s1957_s30  ;;  %19 = sbr.rel (!%p17_p9) target bundleno = 3 (0x3), region = 83 }
 0x597   :  { %1553 = vsyncpa [#allocation3], 1 }
 0x598   :  { %1555 = vsyncpa [#allocation3 + $0x1], 1 }

</bundles_post_ra>
